<compile_context>
chip_gen: v6e
topology: v6e:2x2x1
jax: 0.10.0
libtpu: 0.0.40
codegen_flags: <defaults>
</compile_context>

<pallas_src>
import math
import functools

import jax
import jax.numpy as jnp
from jax.experimental import pallas as pl
from jax.experimental.pallas import tpu as pltpu


# --------------------------------------------------------------------------
# Encoder layer kernel
# --------------------------------------------------------------------------
def _encoder_layer_kernel(num_heads, head_dim,
                          x_ref, mask_ref,
                          wqkv_ref, bqkv_ref, wo_ref, bo_ref,
                          n1w_ref, n1b_ref, w1_ref, b1_ref,
                          w2_ref, b2_ref, n2w_ref, n2b_ref,
                          out_ref, attn_ref):
    Bblk, S, E = x_ref.shape
    H, Dh = num_heads, head_dim
    N = Bblk * S

    x = x_ref[...].astype(jnp.float32)                      # (Bblk, S, E)
    x2d = x.reshape(N, E)                                   # flatten batch*seq

    def matmul(a_f32, w_ref, b_f32):
        # bf16 MXU inputs, f32 accumulation, f32 bias add.
        out = jnp.dot(a_f32.astype(jnp.bfloat16), w_ref[...],
                      preferred_element_type=jnp.float32)
        return out + b_f32

    # ---- fused QKV projection: one MXU pass, N dim = 3E -----------------
    qkv = matmul(x2d, wqkv_ref, bqkv_ref[...])              # (N, 3E) f32
    q = qkv[:, :E].reshape(Bblk, S, E).astype(jnp.bfloat16)
    k = qkv[:, E:2 * E].reshape(Bblk, S, E).astype(jnp.bfloat16)
    v = qkv[:, 2 * E:].reshape(Bblk, S, E).astype(jnp.bfloat16)

    # padding mask: (Bblk, 1, S), broadcast over heads and query positions
    mask_ok = mask_ref[...] != 0.0
    scale = 1.0 / math.sqrt(Dh)
    neg_big = jnp.float32(-1e9)

    probs, ctx = [], []
    for h in range(H):                                      # static unroll
        sl = slice(h * Dh, (h + 1) * Dh)
        qh, kh, vh = q[..., sl], k[..., sl], v[..., sl]     # (Bblk, S, Dh)
        s = jnp.einsum('bqd,bkd->bqk', qh, kh,
                       preferred_element_type=jnp.float32) * scale
        s = jnp.where(mask_ok, s, neg_big)                  # masked_fill(==0)
        s = s - jnp.max(s, axis=-1, keepdims=True)
        p = jnp.exp(s)
        p = p * pl.reciprocal(jnp.sum(p, axis=-1, keepdims=True), approx=True)
        probs.append(p)
        ctx.append(jnp.einsum('bqk,bkd->bqd', p.astype(jnp.bfloat16), vh,
                              preferred_element_type=jnp.float32))

    # single lane-dense (Bblk, H, S, S) store of the attention maps
    attn_ref[...] = jnp.stack(probs, axis=1).astype(attn_ref.dtype)

    attn_out = jnp.concatenate(ctx, axis=-1).reshape(N, E)  # (N, E)
    attn_out = matmul(attn_out, wo_ref, bo_ref[...])        # fc_out

    def layernorm(t, w_ref, b_ref):
        mu = jnp.mean(t, axis=-1, keepdims=True)
        var = jnp.mean((t - mu) ** 2, axis=-1, keepdims=True)
        return (t - mu) * jax.lax.rsqrt(var + 1e-5) * w_ref[...] + b_ref[...]

    # residual + LayerNorm, FFN, residual + LayerNorm (dropout = identity)
    x1 = layernorm(x2d + attn_out, n1w_ref, n1b_ref)
    h1 = jnp.maximum(matmul(x1, w1_ref, b1_ref[...]), 0.0)  # (N, 4E), ReLU
    ff = matmul(h1, w2_ref, b2_ref[...])                    # (N, E)
    x2 = layernorm(x1 + ff, n2w_ref, n2b_ref)

    out_ref[...] = x2.reshape(Bblk, S, E).astype(out_ref.dtype)


def encoder_layer(x, mask3, layer_params, num_heads, block_b=None):
    (wq, bq, wk, bk, wv, bv, wo, bo,
     n1w, n1b, w1, b1, w2, b2, n2w, n2b) = layer_params
    B, S, E = x.shape
    H = num_heads
    Dh = E // H
    hidden = w1.shape[1]
    if block_b is None:
        block_b = B
    assert B % block_b == 0
    nb = B // block_b

    # fuse QKV weights once (glue), cast matmul weights to bf16 for the MXU
    wqkv = jnp.concatenate([wq, wk, wv], axis=1).astype(jnp.bfloat16)  # (E,3E)
    bqkv = jnp.concatenate([bq, bk, bv], axis=1)                        # (1,3E)
    wo_b = wo.astype(jnp.bfloat16)
    w1_b = w1.astype(jnp.bfloat16)
    w2_b = w2.astype(jnp.bfloat16)

    def wspec(shape):
        # grid-invariant weight/bias blocks (full array, never re-fetched)
        return pl.BlockSpec(shape, lambda b: (0,) * len(shape))

    in_specs = [
        pl.BlockSpec((block_b, S, E), lambda b: (b, 0, 0)),     # x
        pl.BlockSpec((block_b, 1, S), lambda b: (b, 0, 0)),     # padding mask
        wspec((E, 3 * E)), wspec((1, 3 * E)),                   # Wqkv, bqkv
        wspec((E, E)), wspec((1, E)),                           # Wo, bo
        wspec((1, E)), wspec((1, E)),                           # norm1 w, b
        wspec((E, hidden)), wspec((1, hidden)),                 # ffn W1, b1
        wspec((hidden, E)), wspec((1, E)),                      # ffn W2, b2
        wspec((1, E)), wspec((1, E)),                           # norm2 w, b
    ]
    out_specs = (
        pl.BlockSpec((block_b, S, E), lambda b: (b, 0, 0)),
        pl.BlockSpec((block_b, H, S, S), lambda b: (b, 0, 0, 0)),
    )
    out_shape = (
        jax.ShapeDtypeStruct((B, S, E), jnp.float32),
        jax.ShapeDtypeStruct((B, H, S, S), jnp.float32),
    )

    kernel = functools.partial(_encoder_layer_kernel, H, Dh)
    return pl.pallas_call(
        kernel,
        grid=(nb,),
        in_specs=in_specs,
        out_specs=out_specs,
        out_shape=out_shape,
        compiler_params=pltpu.CompilerParams(
            dimension_semantics=("parallel",)),
    )(x, mask3, wqkv, bqkv, wo_b, bo, n1w, n1b, w1_b, b1, w2_b, b2, n2w, n2b)


# --------------------------------------------------------------------------
# Classifier head kernel (mean-pool + Linear/ReLU/Linear)
# --------------------------------------------------------------------------
def _classifier_kernel(x_ref, w1_ref, b1_ref, w2_ref, b2_ref, out_ref):
    x = x_ref[...].astype(jnp.float32)                      # (B, S, E)
    pooled = jnp.mean(x, axis=1)                            # x.mean(dim=1)
    h = jnp.dot(pooled.astype(jnp.bfloat16), w1_ref[...],
                preferred_element_type=jnp.float32) + b1_ref[...]
    h = jnp.maximum(h, 0.0)                                 # ReLU (dropout=id)
    logits = jnp.dot(h.astype(jnp.bfloat16), w2_ref[...],
                     preferred_element_type=jnp.float32) + b2_ref[...]
    out_ref[...] = logits.astype(out_ref.dtype)


def classifier_head(x, cw1, cb1, cw2, cb2):
    B, S, E = x.shape
    C = cw2.shape[1]
    return pl.pallas_call(
        _classifier_kernel,
        out_shape=jax.ShapeDtypeStruct((B, C), jnp.float32),
    )(x, cw1.astype(jnp.bfloat16), cb1, cw2.astype(jnp.bfloat16), cb2)


# --------------------------------------------------------------------------
# Full forward (embeddings are plain-JAX glue)
# --------------------------------------------------------------------------
def transformer_classifier_forward(tokens, attention_mask, params, num_heads):
    """tokens (B,S) int32, attention_mask (B,S) -> (logits (B,C), [attn maps])."""
    B, S = tokens.shape
    tok_emb = params["token_embedding"]
    pos_emb = params["position_embedding"]
    x = tok_emb[tokens] + pos_emb[jnp.arange(S)][None, :, :]   # dropout = id
    mask3 = attention_mask.astype(jnp.float32).reshape(B, 1, S)

    attention_maps = []
    for layer_params in params["layers"]:
        x, attn = encoder_layer(x, mask3, layer_params, num_heads)
        attention_maps.append(attn)

    cw1, cb1, cw2, cb2 = params["classifier"]
    logits = classifier_head(x, cw1, cb1, cw2, cb2)
    return logits, attention_maps


# --------------------------------------------------------------------------
# Pure-JAX f32 reference (mirrors the PyTorch module exactly)
# --------------------------------------------------------------------------
def reference_forward(tokens, attention_mask, params, num_heads):
    B, S = tokens.shape
    x = params["token_embedding"][tokens] + \
        params["position_embedding"][jnp.arange(S)][None, :, :]
    E = x.shape[-1]
    Dh = E // num_heads
    mask4 = (attention_mask != 0)[:, None, None, :]
    attn_maps = []

    def ln(t, w, b):
        mu = t.mean(-1, keepdims=True)
        var = ((t - mu) ** 2).mean(-1, keepdims=True)
        return (t - mu) / jnp.sqrt(var + 1e-5) * w + b

    for lp in params["layers"]:
        (wq, bq, wk, bk, wv, bv, wo, bo,
         n1w, n1b, w1, b1, w2, b2, n2w, n2b) = lp
        q = x @ wq + bq
        k = x @ wk + bk
        v = x @ wv + bv

        def split(t):
            return t.reshape(B, S, num_heads, Dh).transpose(0, 2, 1, 3)

        qh, kh, vh = split(q), split(k), split(v)
        scores = (qh @ kh.transpose(0, 1, 3, 2)) / math.sqrt(Dh)
        scores = jnp.where(mask4, scores, jnp.float32(-1e9))
        p = jax.nn.softmax(scores, axis=-1)
        attn_maps.append(p)
        ctx = (p @ vh).transpose(0, 2, 1, 3).reshape(B, S, E)
        attn_out = ctx @ wo + bo
        x = ln(x + attn_out, n1w, n1b)
        ff = jnp.maximum(x @ w1 + b1, 0.0) @ w2 + b2
        x = ln(x + ff, n2w, n2b)

    pooled = x.mean(axis=1)
    cw1, cb1, cw2, cb2 = params["classifier"]
    logits = jnp.maximum(pooled @ cw1 + cb1, 0.0) @ cw2 + cb2
    return logits, attn_maps


# --------------------------------------------------------------------------
# Parameter init (PyTorch-style parameterization, f32)
# --------------------------------------------------------------------------
def init_params(key, vocab_size, embed_size, num_heads, num_layers,
                max_length, num_classes, hidden_dim):
    hidden = 4 * embed_size
    keys = iter(jax.random.split(key, 128))

    def w(shape, scale):
        return jax.random.normal(next(keys), shape, jnp.float32) * scale

    params = {
        "token_embedding": w((vocab_size, embed_size), 0.02),
        "position_embedding": w((max_length, embed_size), 0.02),
        "layers": [],
    }
    s_e = 1.0 / math.sqrt(embed_size)
    s_h = 1.0 / math.sqrt(hidden)
    for _ in range(num_layers):
        layer = (
            w((embed_size, embed_size), s_e), w((1, embed_size), s_e),   # Wq,bq
            w((embed_size, embed_size), s_e), w((1, embed_size), s_e),   # Wk,bk
            w((embed_size, embed_size), s_e), w((1, embed_size), s_e),   # Wv,bv
            w((embed_size, embed_size), s_e), w((1, embed_size), s_e),   # Wo,bo
            jnp.ones((1, embed_size), jnp.float32),                      # n1 w
            jnp.zeros((1, embed_size), jnp.float32),                     # n1 b
            w((embed_size, hidden), s_e), w((1, hidden), s_e),           # W1,b1
            w((hidden, embed_size), s_h), w((1, embed_size), s_h),       # W2,b2
            jnp.ones((1, embed_size), jnp.float32),                      # n2 w
            jnp.zeros((1, embed_size), jnp.float32),                     # n2 b
        )
        params["layers"].append(layer)
    s_c = 1.0 / math.sqrt(hidden_dim)
    params["classifier"] = (
        w((embed_size, hidden_dim), s_e), w((1, hidden_dim), s_e),
        w((hidden_dim, num_classes), s_c), w((1, num_classes), s_c),
    )
    return params


if __name__ == "__main__":
    vocab_size = 50
    embed_size = 32
    num_heads = 4
    num_layers = 2
    max_length = 16
    num_classes = 3
    hidden_dim = 64
    batch, seq = 2, 8

    key = jax.random.PRNGKey(0)
    pkey, tkey = jax.random.split(key)
    params = init_params(pkey, vocab_size, embed_size, num_heads, num_layers,
                         max_length, num_classes, hidden_dim)
    tokens = jax.random.randint(tkey, (batch, seq), 0, vocab_size, jnp.int32)
    # padding mask: last two tokens of sequence 1 are padding
    attention_mask = jnp.ones((batch, seq), jnp.float32).at[1, 6:].set(0.0)

    fwd = jax.jit(lambda t, m, p: transformer_classifier_forward(t, m, p, num_heads))
    logits, attn_maps = fwd(tokens, attention_mask, params)
    logits = jax.block_until_ready(logits)
    attn_maps = [jax.block_until_ready(a) for a in attn_maps]

    # shape / sanity checks
    assert logits.shape == (batch, num_classes)
    assert len(attn_maps) == num_layers
    assert all(a.shape == (batch, num_heads, seq, seq) for a in attn_maps)
    assert bool(jnp.all(jnp.isfinite(logits)))
    for a in attn_maps:
        assert bool(jnp.all(jnp.isfinite(a)))
        assert bool(jnp.allclose(a.sum(-1), 1.0, atol=1e-2))
    # masked (padding) key positions receive ~zero attention
    assert bool(jnp.all(attn_maps[0][1, :, :, 6:] < 1e-6))

    # compare against the pure-JAX f32 reference (bf16 matmuls -> loose tol)
    ref_logits, ref_attn = reference_forward(tokens, attention_mask, params, num_heads)
    assert bool(jnp.max(jnp.abs(logits - ref_logits)) < 0.1)
    for a, ra in zip(attn_maps, ref_attn):
        assert bool(jnp.max(jnp.abs(a - ra)) < 0.05)

    print("KERNEL_OK")
</pallas_src>

<mosaic_0001>
module attributes {stable_mosaic.version = 11 : i64} {
  func.func @_encoder_layer_kernel(%arg0: i32, %arg1: memref<2x8x32xf32, #tpu.memory_space<vmem>>, %arg2: memref<2x1x8xf32, #tpu.memory_space<vmem>>, %arg3: memref<32x96xbf16, #tpu.memory_space<vmem>>, %arg4: memref<1x96xf32, #tpu.memory_space<vmem>>, %arg5: memref<32x32xbf16, #tpu.memory_space<vmem>>, %arg6: memref<1x32xf32, #tpu.memory_space<vmem>>, %arg7: memref<1x32xf32, #tpu.memory_space<vmem>>, %arg8: memref<1x32xf32, #tpu.memory_space<vmem>>, %arg9: memref<32x128xbf16, #tpu.memory_space<vmem>>, %arg10: memref<1x128xf32, #tpu.memory_space<vmem>>, %arg11: memref<128x32xbf16, #tpu.memory_space<vmem>>, %arg12: memref<1x32xf32, #tpu.memory_space<vmem>>, %arg13: memref<1x32xf32, #tpu.memory_space<vmem>>, %arg14: memref<1x32xf32, #tpu.memory_space<vmem>>, %arg15: memref<2x8x32xf32, #tpu.memory_space<vmem>>, %arg16: memref<2x4x8x8xf32, #tpu.memory_space<vmem>>) attributes {dimension_semantics = [#tpu.dimension_semantics<parallel>], iteration_bounds = array<i64: 1>, scalar_prefetch = 0 : i64, scratch_operands = 0 : i64, tpu.core_type = #tpu.core_type<tc>, window_params = [{transform_indices = @transform_0, window_bounds = array<i64: 2, 8, 32>}, {transform_indices = @transform_1, window_bounds = array<i64: 2, 1, 8>}, {pipeline_mode = #tpu.pipeline_mode<synchronous>, transform_indices = @transform_2, window_bounds = array<i64: 32, 96>}, {pipeline_mode = #tpu.pipeline_mode<synchronous>, transform_indices = @transform_3, window_bounds = array<i64: 1, 96>}, {pipeline_mode = #tpu.pipeline_mode<synchronous>, transform_indices = @transform_4, window_bounds = array<i64: 32, 32>}, {pipeline_mode = #tpu.pipeline_mode<synchronous>, transform_indices = @transform_5, window_bounds = array<i64: 1, 32>}, {pipeline_mode = #tpu.pipeline_mode<synchronous>, transform_indices = @transform_6, window_bounds = array<i64: 1, 32>}, {pipeline_mode = #tpu.pipeline_mode<synchronous>, transform_indices = @transform_7, window_bounds = array<i64: 1, 32>}, {pipeline_mode = #tpu.pipeline_mode<synchronous>, transform_indices = @transform_8, window_bounds = array<i64: 32, 128>}, {pipeline_mode = #tpu.pipeline_mode<synchronous>, transform_indices = @transform_9, window_bounds = array<i64: 1, 128>}, {pipeline_mode = #tpu.pipeline_mode<synchronous>, transform_indices = @transform_10, window_bounds = array<i64: 128, 32>}, {pipeline_mode = #tpu.pipeline_mode<synchronous>, transform_indices = @transform_11, window_bounds = array<i64: 1, 32>}, {pipeline_mode = #tpu.pipeline_mode<synchronous>, transform_indices = @transform_12, window_bounds = array<i64: 1, 32>}, {pipeline_mode = #tpu.pipeline_mode<synchronous>, transform_indices = @transform_13, window_bounds = array<i64: 1, 32>}, {transform_indices = @transform_14, window_bounds = array<i64: 2, 8, 32>}, {transform_indices = @transform_15, window_bounds = array<i64: 2, 4, 8, 8>}]} {
    %c0 = arith.constant 0 : index
    %c0_0 = arith.constant 0 : index
    %c0_1 = arith.constant 0 : index
    %0 = vector.load %arg1[%c0, %c0_0, %c0_1] : memref<2x8x32xf32, #tpu.memory_space<vmem>>, vector<2x8x32xf32>
    %1 = vector.shape_cast %0 : vector<2x8x32xf32> to vector<16x32xf32>
    %c0_2 = arith.constant 0 : index
    %c0_3 = arith.constant 0 : index
    %2 = vector.load %arg4[%c0_2, %c0_3] : memref<1x96xf32, #tpu.memory_space<vmem>>, vector<1x96xf32>
    %3 = arith.truncf %1 : vector<16x32xf32> to vector<16x32xbf16>
    %c0_4 = arith.constant 0 : index
    %c0_5 = arith.constant 0 : index
    %4 = vector.load %arg3[%c0_4, %c0_5] : memref<32x96xbf16, #tpu.memory_space<vmem>>, vector<32x96xbf16>
    %cst = arith.constant dense<0.000000e+00> : vector<16x96xf32>
    %5 = tpu.matmul %3, %4, %cst {dimension_numbers = #tpu.dot_dimension_numbers<[1], [0], [0], [1], [0, 0, 1, 1], [], []>} : vector<16x32xbf16>, vector<32x96xbf16>, vector<16x96xf32> -> vector<16x96xf32>
    %6 = vector.broadcast %2 : vector<1x96xf32> to vector<16x96xf32>
    %7 = arith.addf %5, %6 : vector<16x96xf32>
    %8 = vector.extract_strided_slice %7 {offsets = [0, 0], sizes = [16, 32], strides = [1, 1]} : vector<16x96xf32> to vector<16x32xf32>
    %9 = vector.shape_cast %8 : vector<16x32xf32> to vector<2x8x32xf32>
    %10 = arith.truncf %9 : vector<2x8x32xf32> to vector<2x8x32xbf16>
    %11 = vector.extract_strided_slice %7 {offsets = [0, 32], sizes = [16, 32], strides = [1, 1]} : vector<16x96xf32> to vector<16x32xf32>
    %12 = vector.shape_cast %11 : vector<16x32xf32> to vector<2x8x32xf32>
    %13 = arith.truncf %12 : vector<2x8x32xf32> to vector<2x8x32xbf16>
    %14 = vector.extract_strided_slice %7 {offsets = [0, 64], sizes = [16, 32], strides = [1, 1]} : vector<16x96xf32> to vector<16x32xf32>
    %15 = vector.shape_cast %14 : vector<16x32xf32> to vector<2x8x32xf32>
    %16 = arith.truncf %15 : vector<2x8x32xf32> to vector<2x8x32xbf16>
    %c0_6 = arith.constant 0 : index
    %c0_7 = arith.constant 0 : index
    %c0_8 = arith.constant 0 : index
    %17 = vector.load %arg2[%c0_6, %c0_7, %c0_8] : memref<2x1x8xf32, #tpu.memory_space<vmem>>, vector<2x1x8xf32>
    %cst_9 = arith.constant 0.000000e+00 : f32
    %18 = vector.broadcast %cst_9 : f32 to vector<2x1x8xf32>
    %19 = arith.cmpf one, %17, %18 : vector<2x1x8xf32>
    %20 = vector.extract_strided_slice %10 {offsets = [0, 0, 0], sizes = [2, 8, 8], strides = [1, 1, 1]} : vector<2x8x32xbf16> to vector<2x8x8xbf16>
    %21 = vector.extract_strided_slice %13 {offsets = [0, 0, 0], sizes = [2, 8, 8], strides = [1, 1, 1]} : vector<2x8x32xbf16> to vector<2x8x8xbf16>
    %22 = vector.extract_strided_slice %16 {offsets = [0, 0, 0], sizes = [2, 8, 8], strides = [1, 1, 1]} : vector<2x8x32xbf16> to vector<2x8x8xbf16>
    "tpu.trace_start"() <{level = 10 : i32, message = "bqd,bkd->bqk"}> : () -> ()
    %cst_10 = arith.constant dense<0.000000e+00> : vector<2x8x8xf32>
    %23 = tpu.matmul %20, %21, %cst_10 {dimension_numbers = #tpu.dot_dimension_numbers<[2], [2], [1], [1], [0, 0, 0, 1, 1, 1], [0], [0]>} : vector<2x8x8xbf16>, vector<2x8x8xbf16>, vector<2x8x8xf32> -> vector<2x8x8xf32>
    "tpu.trace_stop"() : () -> ()
    %cst_11 = arith.constant 0.353553385 : f32
    %24 = vector.broadcast %cst_11 : f32 to vector<2x8x8xf32>
    %25 = arith.mulf %23, %24 : vector<2x8x8xf32>
    %cst_12 = arith.constant -1.000000e+09 : f32
    %26 = vector.shape_cast %19 : vector<2x1x8xi1> to vector<2x1x8xi1>
    %27 = vector.broadcast %26 : vector<2x1x8xi1> to vector<2x8x8xi1>
    %28 = vector.broadcast %cst_12 : f32 to vector<2x8x8xf32>
    %29 = arith.select %27, %25, %28 : vector<2x8x8xi1>, vector<2x8x8xf32>
    %cst_13 = arith.constant dense<0xFF800000> : vector<2x8xf32>
    %30 = vector.multi_reduction <maximumf>, %29, %cst_13 [2] : vector<2x8x8xf32> to vector<2x8xf32>
    %31 = vector.shape_cast %30 : vector<2x8xf32> to vector<2x8x1xf32>
    %32 = vector.broadcast %31 : vector<2x8x1xf32> to vector<2x8x8xf32>
    %33 = arith.subf %29, %32 : vector<2x8x8xf32>
    %34 = math.exp %33 : vector<2x8x8xf32>
    %cst_14 = arith.constant dense<0.000000e+00> : vector<2x8xf32>
    %35 = vector.multi_reduction <add>, %34, %cst_14 [2] : vector<2x8x8xf32> to vector<2x8xf32>
    %36 = vector.shape_cast %35 : vector<2x8xf32> to vector<2x8x1xf32>
    %37 = tpu.reciprocal %36 {approx = true} : vector<2x8x1xf32> -> vector<2x8x1xf32>
    %38 = vector.broadcast %37 : vector<2x8x1xf32> to vector<2x8x8xf32>
    %39 = arith.mulf %34, %38 : vector<2x8x8xf32>
    %40 = arith.truncf %39 : vector<2x8x8xf32> to vector<2x8x8xbf16>
    "tpu.trace_start"() <{level = 10 : i32, message = "bqk,bkd->bqd"}> : () -> ()
    %cst_15 = arith.constant dense<0.000000e+00> : vector<2x8x8xf32>
    %41 = tpu.matmul %40, %22, %cst_15 {dimension_numbers = #tpu.dot_dimension_numbers<[2], [1], [1], [2], [0, 0, 0, 1, 1, 2], [0], [0]>} : vector<2x8x8xbf16>, vector<2x8x8xbf16>, vector<2x8x8xf32> -> vector<2x8x8xf32>
    "tpu.trace_stop"() : () -> ()
    %42 = vector.extract_strided_slice %10 {offsets = [0, 0, 8], sizes = [2, 8, 8], strides = [1, 1, 1]} : vector<2x8x32xbf16> to vector<2x8x8xbf16>
    %43 = vector.extract_strided_slice %13 {offsets = [0, 0, 8], sizes = [2, 8, 8], strides = [1, 1, 1]} : vector<2x8x32xbf16> to vector<2x8x8xbf16>
    %44 = vector.extract_strided_slice %16 {offsets = [0, 0, 8], sizes = [2, 8, 8], strides = [1, 1, 1]} : vector<2x8x32xbf16> to vector<2x8x8xbf16>
    "tpu.trace_start"() <{level = 10 : i32, message = "bqd,bkd->bqk"}> : () -> ()
    %cst_16 = arith.constant dense<0.000000e+00> : vector<2x8x8xf32>
    %45 = tpu.matmul %42, %43, %cst_16 {dimension_numbers = #tpu.dot_dimension_numbers<[2], [2], [1], [1], [0, 0, 0, 1, 1, 1], [0], [0]>} : vector<2x8x8xbf16>, vector<2x8x8xbf16>, vector<2x8x8xf32> -> vector<2x8x8xf32>
    "tpu.trace_stop"() : () -> ()
    %cst_17 = arith.constant 0.353553385 : f32
    %46 = vector.broadcast %cst_17 : f32 to vector<2x8x8xf32>
    %47 = arith.mulf %45, %46 : vector<2x8x8xf32>
    %cst_18 = arith.constant -1.000000e+09 : f32
    %48 = vector.shape_cast %19 : vector<2x1x8xi1> to vector<2x1x8xi1>
    %49 = vector.broadcast %48 : vector<2x1x8xi1> to vector<2x8x8xi1>
    %50 = vector.broadcast %cst_18 : f32 to vector<2x8x8xf32>
    %51 = arith.select %49, %47, %50 : vector<2x8x8xi1>, vector<2x8x8xf32>
    %cst_19 = arith.constant dense<0xFF800000> : vector<2x8xf32>
    %52 = vector.multi_reduction <maximumf>, %51, %cst_19 [2] : vector<2x8x8xf32> to vector<2x8xf32>
    %53 = vector.shape_cast %52 : vector<2x8xf32> to vector<2x8x1xf32>
    %54 = vector.broadcast %53 : vector<2x8x1xf32> to vector<2x8x8xf32>
    %55 = arith.subf %51, %54 : vector<2x8x8xf32>
    %56 = math.exp %55 : vector<2x8x8xf32>
    %cst_20 = arith.constant dense<0.000000e+00> : vector<2x8xf32>
    %57 = vector.multi_reduction <add>, %56, %cst_20 [2] : vector<2x8x8xf32> to vector<2x8xf32>
    %58 = vector.shape_cast %57 : vector<2x8xf32> to vector<2x8x1xf32>
    %59 = tpu.reciprocal %58 {approx = true} : vector<2x8x1xf32> -> vector<2x8x1xf32>
    %60 = vector.broadcast %59 : vector<2x8x1xf32> to vector<2x8x8xf32>
    %61 = arith.mulf %56, %60 : vector<2x8x8xf32>
    %62 = arith.truncf %61 : vector<2x8x8xf32> to vector<2x8x8xbf16>
    "tpu.trace_start"() <{level = 10 : i32, message = "bqk,bkd->bqd"}> : () -> ()
    %cst_21 = arith.constant dense<0.000000e+00> : vector<2x8x8xf32>
    %63 = tpu.matmul %62, %44, %cst_21 {dimension_numbers = #tpu.dot_dimension_numbers<[2], [1], [1], [2], [0, 0, 0, 1, 1, 2], [0], [0]>} : vector<2x8x8xbf16>, vector<2x8x8xbf16>, vector<2x8x8xf32> -> vector<2x8x8xf32>
    "tpu.trace_stop"() : () -> ()
    %64 = vector.extract_strided_slice %10 {offsets = [0, 0, 16], sizes = [2, 8, 8], strides = [1, 1, 1]} : vector<2x8x32xbf16> to vector<2x8x8xbf16>
    %65 = vector.extract_strided_slice %13 {offsets = [0, 0, 16], sizes = [2, 8, 8], strides = [1, 1, 1]} : vector<2x8x32xbf16> to vector<2x8x8xbf16>
    %66 = vector.extract_strided_slice %16 {offsets = [0, 0, 16], sizes = [2, 8, 8], strides = [1, 1, 1]} : vector<2x8x32xbf16> to vector<2x8x8xbf16>
    "tpu.trace_start"() <{level = 10 : i32, message = "bqd,bkd->bqk"}> : () -> ()
    %cst_22 = arith.constant dense<0.000000e+00> : vector<2x8x8xf32>
    %67 = tpu.matmul %64, %65, %cst_22 {dimension_numbers = #tpu.dot_dimension_numbers<[2], [2], [1], [1], [0, 0, 0, 1, 1, 1], [0], [0]>} : vector<2x8x8xbf16>, vector<2x8x8xbf16>, vector<2x8x8xf32> -> vector<2x8x8xf32>
    "tpu.trace_stop"() : () -> ()
    %cst_23 = arith.constant 0.353553385 : f32
    %68 = vector.broadcast %cst_23 : f32 to vector<2x8x8xf32>
    %69 = arith.mulf %67, %68 : vector<2x8x8xf32>
    %cst_24 = arith.constant -1.000000e+09 : f32
    %70 = vector.shape_cast %19 : vector<2x1x8xi1> to vector<2x1x8xi1>
    %71 = vector.broadcast %70 : vector<2x1x8xi1> to vector<2x8x8xi1>
    %72 = vector.broadcast %cst_24 : f32 to vector<2x8x8xf32>
    %73 = arith.select %71, %69, %72 : vector<2x8x8xi1>, vector<2x8x8xf32>
    %cst_25 = arith.constant dense<0xFF800000> : vector<2x8xf32>
    %74 = vector.multi_reduction <maximumf>, %73, %cst_25 [2] : vector<2x8x8xf32> to vector<2x8xf32>
    %75 = vector.shape_cast %74 : vector<2x8xf32> to vector<2x8x1xf32>
    %76 = vector.broadcast %75 : vector<2x8x1xf32> to vector<2x8x8xf32>
    %77 = arith.subf %73, %76 : vector<2x8x8xf32>
    %78 = math.exp %77 : vector<2x8x8xf32>
    %cst_26 = arith.constant dense<0.000000e+00> : vector<2x8xf32>
    %79 = vector.multi_reduction <add>, %78, %cst_26 [2] : vector<2x8x8xf32> to vector<2x8xf32>
    %80 = vector.shape_cast %79 : vector<2x8xf32> to vector<2x8x1xf32>
    %81 = tpu.reciprocal %80 {approx = true} : vector<2x8x1xf32> -> vector<2x8x1xf32>
    %82 = vector.broadcast %81 : vector<2x8x1xf32> to vector<2x8x8xf32>
    %83 = arith.mulf %78, %82 : vector<2x8x8xf32>
    %84 = arith.truncf %83 : vector<2x8x8xf32> to vector<2x8x8xbf16>
    "tpu.trace_start"() <{level = 10 : i32, message = "bqk,bkd->bqd"}> : () -> ()
    %cst_27 = arith.constant dense<0.000000e+00> : vector<2x8x8xf32>
    %85 = tpu.matmul %84, %66, %cst_27 {dimension_numbers = #tpu.dot_dimension_numbers<[2], [1], [1], [2], [0, 0, 0, 1, 1, 2], [0], [0]>} : vector<2x8x8xbf16>, vector<2x8x8xbf16>, vector<2x8x8xf32> -> vector<2x8x8xf32>
    "tpu.trace_stop"() : () -> ()
    %86 = vector.extract_strided_slice %10 {offsets = [0, 0, 24], sizes = [2, 8, 8], strides = [1, 1, 1]} : vector<2x8x32xbf16> to vector<2x8x8xbf16>
    %87 = vector.extract_strided_slice %13 {offsets = [0, 0, 24], sizes = [2, 8, 8], strides = [1, 1, 1]} : vector<2x8x32xbf16> to vector<2x8x8xbf16>
    %88 = vector.extract_strided_slice %16 {offsets = [0, 0, 24], sizes = [2, 8, 8], strides = [1, 1, 1]} : vector<2x8x32xbf16> to vector<2x8x8xbf16>
    "tpu.trace_start"() <{level = 10 : i32, message = "bqd,bkd->bqk"}> : () -> ()
    %cst_28 = arith.constant dense<0.000000e+00> : vector<2x8x8xf32>
    %89 = tpu.matmul %86, %87, %cst_28 {dimension_numbers = #tpu.dot_dimension_numbers<[2], [2], [1], [1], [0, 0, 0, 1, 1, 1], [0], [0]>} : vector<2x8x8xbf16>, vector<2x8x8xbf16>, vector<2x8x8xf32> -> vector<2x8x8xf32>
    "tpu.trace_stop"() : () -> ()
    %cst_29 = arith.constant 0.353553385 : f32
    %90 = vector.broadcast %cst_29 : f32 to vector<2x8x8xf32>
    %91 = arith.mulf %89, %90 : vector<2x8x8xf32>
    %cst_30 = arith.constant -1.000000e+09 : f32
    %92 = vector.shape_cast %19 : vector<2x1x8xi1> to vector<2x1x8xi1>
    %93 = vector.broadcast %92 : vector<2x1x8xi1> to vector<2x8x8xi1>
    %94 = vector.broadcast %cst_30 : f32 to vector<2x8x8xf32>
    %95 = arith.select %93, %91, %94 : vector<2x8x8xi1>, vector<2x8x8xf32>
    %cst_31 = arith.constant dense<0xFF800000> : vector<2x8xf32>
    %96 = vector.multi_reduction <maximumf>, %95, %cst_31 [2] : vector<2x8x8xf32> to vector<2x8xf32>
    %97 = vector.shape_cast %96 : vector<2x8xf32> to vector<2x8x1xf32>
    %98 = vector.broadcast %97 : vector<2x8x1xf32> to vector<2x8x8xf32>
    %99 = arith.subf %95, %98 : vector<2x8x8xf32>
    %100 = math.exp %99 : vector<2x8x8xf32>
    %cst_32 = arith.constant dense<0.000000e+00> : vector<2x8xf32>
    %101 = vector.multi_reduction <add>, %100, %cst_32 [2] : vector<2x8x8xf32> to vector<2x8xf32>
    %102 = vector.shape_cast %101 : vector<2x8xf32> to vector<2x8x1xf32>
    %103 = tpu.reciprocal %102 {approx = true} : vector<2x8x1xf32> -> vector<2x8x1xf32>
    %104 = vector.broadcast %103 : vector<2x8x1xf32> to vector<2x8x8xf32>
    %105 = arith.mulf %100, %104 : vector<2x8x8xf32>
    %106 = arith.truncf %105 : vector<2x8x8xf32> to vector<2x8x8xbf16>
    "tpu.trace_start"() <{level = 10 : i32, message = "bqk,bkd->bqd"}> : () -> ()
    %cst_33 = arith.constant dense<0.000000e+00> : vector<2x8x8xf32>
    %107 = tpu.matmul %106, %88, %cst_33 {dimension_numbers = #tpu.dot_dimension_numbers<[2], [1], [1], [2], [0, 0, 0, 1, 1, 2], [0], [0]>} : vector<2x8x8xbf16>, vector<2x8x8xbf16>, vector<2x8x8xf32> -> vector<2x8x8xf32>
    "tpu.trace_stop"() : () -> ()
    %108 = vector.shape_cast %39 : vector<2x8x8xf32> to vector<2x1x8x8xf32>
    %109 = vector.shape_cast %61 : vector<2x8x8xf32> to vector<2x1x8x8xf32>
    %110 = vector.shape_cast %83 : vector<2x8x8xf32> to vector<2x1x8x8xf32>
    %111 = vector.shape_cast %105 : vector<2x8x8xf32> to vector<2x1x8x8xf32>
    %112 = tpu.concatenate %108, %109, %110, %111 in 1 : vector<2x1x8x8xf32>, vector<2x1x8x8xf32>, vector<2x1x8x8xf32>, vector<2x1x8x8xf32> -> vector<2x4x8x8xf32>
    %c0_34 = arith.constant 0 : index
    %c0_35 = arith.constant 0 : index
    %c0_36 = arith.constant 0 : index
    %c0_37 = arith.constant 0 : index
    %113 = vector.load %arg16[%c0_34, %c0_35, %c0_36, %c0_37] : memref<2x4x8x8xf32, #tpu.memory_space<vmem>>, vector<2x4x8x8xf32>
    tpu.vector_store %arg16[%c0_34, %c0_35, %c0_36, %c0_37], %112 {strides = array<i32>} : memref<2x4x8x8xf32, #tpu.memory_space<vmem>>, vector<2x4x8x8xf32>,
    %114 = tpu.concatenate %41, %63, %85, %107 in 2 : vector<2x8x8xf32>, vector<2x8x8xf32>, vector<2x8x8xf32>, vector<2x8x8xf32> -> vector<2x8x32xf32>
    %115 = vector.shape_cast %114 : vector<2x8x32xf32> to vector<16x32xf32>
    %c0_38 = arith.constant 0 : index
    %c0_39 = arith.constant 0 : index
    %116 = vector.load %arg6[%c0_38, %c0_39] : memref<1x32xf32, #tpu.memory_space<vmem>>, vector<1x32xf32>
    %117 = arith.truncf %115 : vector<16x32xf32> to vector<16x32xbf16>
    %c0_40 = arith.constant 0 : index
    %c0_41 = arith.constant 0 : index
    %118 = vector.load %arg5[%c0_40, %c0_41] : memref<32x32xbf16, #tpu.memory_space<vmem>>, vector<32x32xbf16>
    %cst_42 = arith.constant dense<0.000000e+00> : vector<16x32xf32>
    %119 = tpu.matmul %117, %118, %cst_42 {dimension_numbers = #tpu.dot_dimension_numbers<[1], [0], [0], [1], [0, 0, 1, 1], [], []>} : vector<16x32xbf16>, vector<32x32xbf16>, vector<16x32xf32> -> vector<16x32xf32>
    %120 = vector.broadcast %116 : vector<1x32xf32> to vector<16x32xf32>
    %121 = arith.addf %119, %120 : vector<16x32xf32>
    %122 = arith.addf %1, %121 : vector<16x32xf32>
    %cst_43 = arith.constant dense<0.000000e+00> : vector<16xf32>
    %123 = vector.multi_reduction <add>, %122, %cst_43 [1] : vector<16x32xf32> to vector<16xf32>
    %124 = vector.shape_cast %123 : vector<16xf32> to vector<16x1xf32>
    %cst_44 = arith.constant 3.200000e+01 : f32
    %125 = vector.broadcast %cst_44 : f32 to vector<16x1xf32>
    %126 = arith.divf %124, %125 : vector<16x1xf32>
    %127 = vector.broadcast %126 : vector<16x1xf32> to vector<16x32xf32>
    %128 = arith.subf %122, %127 : vector<16x32xf32>
    %129 = arith.mulf %128, %128 : vector<16x32xf32>
    %cst_45 = arith.constant dense<0.000000e+00> : vector<16xf32>
    %130 = vector.multi_reduction <add>, %129, %cst_45 [1] : vector<16x32xf32> to vector<16xf32>
    %131 = vector.shape_cast %130 : vector<16xf32> to vector<16x1xf32>
    %cst_46 = arith.constant 3.200000e+01 : f32
    %132 = vector.broadcast %cst_46 : f32 to vector<16x1xf32>
    %133 = arith.divf %131, %132 : vector<16x1xf32>
    %134 = vector.broadcast %126 : vector<16x1xf32> to vector<16x32xf32>
    %135 = arith.subf %122, %134 : vector<16x32xf32>
    %cst_47 = arith.constant 9.99999974E-6 : f32
    %136 = vector.broadcast %cst_47 : f32 to vector<16x1xf32>
    %137 = arith.addf %133, %136 : vector<16x1xf32>
    %138 = math.rsqrt %137 : vector<16x1xf32>
    %139 = vector.broadcast %138 : vector<16x1xf32> to vector<16x32xf32>
    %140 = arith.mulf %135, %139 : vector<16x32xf32>
    %c0_48 = arith.constant 0 : index
    %c0_49 = arith.constant 0 : index
    %141 = vector.load %arg7[%c0_48, %c0_49] : memref<1x32xf32, #tpu.memory_space<vmem>>, vector<1x32xf32>
    %142 = vector.broadcast %141 : vector<1x32xf32> to vector<16x32xf32>
    %143 = arith.mulf %140, %142 : vector<16x32xf32>
    %c0_50 = arith.constant 0 : index
    %c0_51 = arith.constant 0 : index
    %144 = vector.load %arg8[%c0_50, %c0_51] : memref<1x32xf32, #tpu.memory_space<vmem>>, vector<1x32xf32>
    %145 = vector.broadcast %144 : vector<1x32xf32> to vector<16x32xf32>
    %146 = arith.addf %143, %145 : vector<16x32xf32>
    %c0_52 = arith.constant 0 : index
    %c0_53 = arith.constant 0 : index
    %147 = vector.load %arg10[%c0_52, %c0_53] : memref<1x128xf32, #tpu.memory_space<vmem>>, vector<1x128xf32>
    %148 = arith.truncf %146 : vector<16x32xf32> to vector<16x32xbf16>
    %c0_54 = arith.constant 0 : index
    %c0_55 = arith.constant 0 : index
    %149 = vector.load %arg9[%c0_54, %c0_55] : memref<32x128xbf16, #tpu.memory_space<vmem>>, vector<32x128xbf16>
    %cst_56 = arith.constant dense<0.000000e+00> : vector<16x128xf32>
    %150 = tpu.matmul %148, %149, %cst_56 {dimension_numbers = #tpu.dot_dimension_numbers<[1], [0], [0], [1], [0, 0, 1, 1], [], []>} : vector<16x32xbf16>, vector<32x128xbf16>, vector<16x128xf32> -> vector<16x128xf32>
    %151 = vector.broadcast %147 : vector<1x128xf32> to vector<16x128xf32>
    %152 = arith.addf %150, %151 : vector<16x128xf32>
    %cst_57 = arith.constant 0.000000e+00 : f32
    %153 = vector.broadcast %cst_57 : f32 to vector<16x128xf32>
    %154 = arith.maximumf %152, %153 : vector<16x128xf32>
    %c0_58 = arith.constant 0 : index
    %c0_59 = arith.constant 0 : index
    %155 = vector.load %arg12[%c0_58, %c0_59] : memref<1x32xf32, #tpu.memory_space<vmem>>, vector<1x32xf32>
    %156 = arith.truncf %154 : vector<16x128xf32> to vector<16x128xbf16>
    %c0_60 = arith.constant 0 : index
    %c0_61 = arith.constant 0 : index
    %157 = vector.load %arg11[%c0_60, %c0_61] : memref<128x32xbf16, #tpu.memory_space<vmem>>, vector<128x32xbf16>
    %cst_62 = arith.constant dense<0.000000e+00> : vector<16x32xf32>
    %158 = tpu.matmul %156, %157, %cst_62 {dimension_numbers = #tpu.dot_dimension_numbers<[1], [0], [0], [1], [0, 0, 1, 1], [], []>} : vector<16x128xbf16>, vector<128x32xbf16>, vector<16x32xf32> -> vector<16x32xf32>
    %159 = vector.broadcast %155 : vector<1x32xf32> to vector<16x32xf32>
    %160 = arith.addf %158, %159 : vector<16x32xf32>
    %161 = arith.addf %146, %160 : vector<16x32xf32>
    %cst_63 = arith.constant dense<0.000000e+00> : vector<16xf32>
    %162 = vector.multi_reduction <add>, %161, %cst_63 [1] : vector<16x32xf32> to vector<16xf32>
    %163 = vector.shape_cast %162 : vector<16xf32> to vector<16x1xf32>
    %cst_64 = arith.constant 3.200000e+01 : f32
    %164 = vector.broadcast %cst_64 : f32 to vector<16x1xf32>
    %165 = arith.divf %163, %164 : vector<16x1xf32>
    %166 = vector.broadcast %165 : vector<16x1xf32> to vector<16x32xf32>
    %167 = arith.subf %161, %166 : vector<16x32xf32>
    %168 = arith.mulf %167, %167 : vector<16x32xf32>
    %cst_65 = arith.constant dense<0.000000e+00> : vector<16xf32>
    %169 = vector.multi_reduction <add>, %168, %cst_65 [1] : vector<16x32xf32> to vector<16xf32>
    %170 = vector.shape_cast %169 : vector<16xf32> to vector<16x1xf32>
    %cst_66 = arith.constant 3.200000e+01 : f32
    %171 = vector.broadcast %cst_66 : f32 to vector<16x1xf32>
    %172 = arith.divf %170, %171 : vector<16x1xf32>
    %173 = vector.broadcast %165 : vector<16x1xf32> to vector<16x32xf32>
    %174 = arith.subf %161, %173 : vector<16x32xf32>
    %cst_67 = arith.constant 9.99999974E-6 : f32
    %175 = vector.broadcast %cst_67 : f32 to vector<16x1xf32>
    %176 = arith.addf %172, %175 : vector<16x1xf32>
    %177 = math.rsqrt %176 : vector<16x1xf32>
    %178 = vector.broadcast %177 : vector<16x1xf32> to vector<16x32xf32>
    %179 = arith.mulf %174, %178 : vector<16x32xf32>
    %c0_68 = arith.constant 0 : index
    %c0_69 = arith.constant 0 : index
    %180 = vector.load %arg13[%c0_68, %c0_69] : memref<1x32xf32, #tpu.memory_space<vmem>>, vector<1x32xf32>
    %181 = vector.broadcast %180 : vector<1x32xf32> to vector<16x32xf32>
    %182 = arith.mulf %179, %181 : vector<16x32xf32>
    %c0_70 = arith.constant 0 : index
    %c0_71 = arith.constant 0 : index
    %183 = vector.load %arg14[%c0_70, %c0_71] : memref<1x32xf32, #tpu.memory_space<vmem>>, vector<1x32xf32>
    %184 = vector.broadcast %183 : vector<1x32xf32> to vector<16x32xf32>
    %185 = arith.addf %182, %184 : vector<16x32xf32>
    %186 = vector.shape_cast %185 : vector<16x32xf32> to vector<2x8x32xf32>
    %c0_72 = arith.constant 0 : index
    %c0_73 = arith.constant 0 : index
    %c0_74 = arith.constant 0 : index
    %187 = vector.load %arg15[%c0_72, %c0_73, %c0_74] : memref<2x8x32xf32, #tpu.memory_space<vmem>>, vector<2x8x32xf32>
    tpu.vector_store %arg15[%c0_72, %c0_73, %c0_74], %186 {strides = array<i32>} : memref<2x8x32xf32, #tpu.memory_space<vmem>>, vector<2x8x32xf32>,
    return
  }
  func.func @transform_0(%arg0: i32) -> (i32, i32, i32) {
    %c0_i32 = arith.constant 0 : i32
    %c0_i32_0 = arith.constant 0 : i32
    %c0_i32_1 = arith.constant 0 : i32
    return %arg0, %c0_i32, %c0_i32_0 : i32, i32, i32
  }
  func.func @transform_1(%arg0: i32) -> (i32, i32, i32) {
    %c0_i32 = arith.constant 0 : i32
    %c0_i32_0 = arith.constant 0 : i32
    %c0_i32_1 = arith.constant 0 : i32
    return %arg0, %c0_i32, %c0_i32_0 : i32, i32, i32
  }
  func.func @transform_2(%arg0: i32) -> (i32, i32) {
    %c0_i32 = arith.constant 0 : i32
    %c0_i32_0 = arith.constant 0 : i32
    %c0_i32_1 = arith.constant 0 : i32
    return %c0_i32, %c0_i32_0 : i32, i32
  }
  func.func @transform_3(%arg0: i32) -> (i32, i32) {
    %c0_i32 = arith.constant 0 : i32
    %c0_i32_0 = arith.constant 0 : i32
    %c0_i32_1 = arith.constant 0 : i32
    return %c0_i32, %c0_i32_0 : i32, i32
  }
  func.func @transform_4(%arg0: i32) -> (i32, i32) {
    %c0_i32 = arith.constant 0 : i32
    %c0_i32_0 = arith.constant 0 : i32
    %c0_i32_1 = arith.constant 0 : i32
    return %c0_i32, %c0_i32_0 : i32, i32
  }
  func.func @transform_5(%arg0: i32) -> (i32, i32) {
    %c0_i32 = arith.constant 0 : i32
    %c0_i32_0 = arith.constant 0 : i32
    %c0_i32_1 = arith.constant 0 : i32
    return %c0_i32, %c0_i32_0 : i32, i32
  }
  func.func @transform_6(%arg0: i32) -> (i32, i32) {
    %c0_i32 = arith.constant 0 : i32
    %c0_i32_0 = arith.constant 0 : i32
    %c0_i32_1 = arith.constant 0 : i32
    return %c0_i32, %c0_i32_0 : i32, i32
  }
  func.func @transform_7(%arg0: i32) -> (i32, i32) {
    %c0_i32 = arith.constant 0 : i32
    %c0_i32_0 = arith.constant 0 : i32
    %c0_i32_1 = arith.constant 0 : i32
    return %c0_i32, %c0_i32_0 : i32, i32
  }
  func.func @transform_8(%arg0: i32) -> (i32, i32) {
    %c0_i32 = arith.constant 0 : i32
    %c0_i32_0 = arith.constant 0 : i32
    %c0_i32_1 = arith.constant 0 : i32
    return %c0_i32, %c0_i32_0 : i32, i32
  }
  func.func @transform_9(%arg0: i32) -> (i32, i32) {
    %c0_i32 = arith.constant 0 : i32
    %c0_i32_0 = arith.constant 0 : i32
    %c0_i32_1 = arith.constant 0 : i32
    return %c0_i32, %c0_i32_0 : i32, i32
  }
  func.func @transform_10(%arg0: i32) -> (i32, i32) {
    %c0_i32 = arith.constant 0 : i32
    %c0_i32_0 = arith.constant 0 : i32
    %c0_i32_1 = arith.constant 0 : i32
    return %c0_i32, %c0_i32_0 : i32, i32
  }
  func.func @transform_11(%arg0: i32) -> (i32, i32) {
    %c0_i32 = arith.constant 0 : i32
    %c0_i32_0 = arith.constant 0 : i32
    %c0_i32_1 = arith.constant 0 : i32
    return %c0_i32, %c0_i32_0 : i32, i32
  }
  func.func @transform_12(%arg0: i32) -> (i32, i32) {
    %c0_i32 = arith.constant 0 : i32
    %c0_i32_0 = arith.constant 0 : i32
    %c0_i32_1 = arith.constant 0 : i32
    return %c0_i32, %c0_i32_0 : i32, i32
  }
  func.func @transform_13(%arg0: i32) -> (i32, i32) {
    %c0_i32 = arith.constant 0 : i32
    %c0_i32_0 = arith.constant 0 : i32
    %c0_i32_1 = arith.constant 0 : i32
    return %c0_i32, %c0_i32_0 : i32, i32
  }
  func.func @transform_14(%arg0: i32) -> (i32, i32, i32) {
    %c0_i32 = arith.constant 0 : i32
    %c0_i32_0 = arith.constant 0 : i32
    %c0_i32_1 = arith.constant 0 : i32
    return %arg0, %c0_i32, %c0_i32_0 : i32, i32, i32
  }
  func.func @transform_15(%arg0: i32) -> (i32, i32, i32, i32) {
    %c0_i32 = arith.constant 0 : i32
    %c0_i32_0 = arith.constant 0 : i32
    %c0_i32_1 = arith.constant 0 : i32
    %c0_i32_2 = arith.constant 0 : i32
    return %arg0, %c0_i32, %c0_i32_0, %c0_i32_1 : i32, i32, i32, i32
  }
}

module attributes {stable_mosaic.version = 11 : i64} {
  func.func @_classifier_kernel(%arg0: memref<2x8x32xf32, #tpu.memory_space<vmem>>, %arg1: memref<32x64xbf16, #tpu.memory_space<vmem>>, %arg2: memref<1x64xf32, #tpu.memory_space<vmem>>, %arg3: memref<64x3xbf16, #tpu.memory_space<vmem>>, %arg4: memref<1x3xf32, #tpu.memory_space<vmem>>, %arg5: memref<2x3xf32, #tpu.memory_space<vmem>>) attributes {dimension_semantics = [], scalar_prefetch = 0 : i64, scratch_operands = 0 : i64, tpu.core_type = #tpu.core_type<tc>} {
    %c0 = arith.constant 0 : index
    %c0_0 = arith.constant 0 : index
    %c0_1 = arith.constant 0 : index
    %0 = vector.load %arg0[%c0, %c0_0, %c0_1] : memref<2x8x32xf32, #tpu.memory_space<vmem>>, vector<2x8x32xf32>
    %cst = arith.constant dense<0.000000e+00> : vector<2x32xf32>
    %1 = vector.multi_reduction <add>, %0, %cst [1] : vector<2x8x32xf32> to vector<2x32xf32>
    %cst_2 = arith.constant 8.000000e+00 : f32
    %2 = vector.broadcast %cst_2 : f32 to vector<2x32xf32>
    %3 = arith.divf %1, %2 : vector<2x32xf32>
    %4 = arith.truncf %3 : vector<2x32xf32> to vector<2x32xbf16>
    %c0_3 = arith.constant 0 : index
    %c0_4 = arith.constant 0 : index
    %5 = vector.load %arg1[%c0_3, %c0_4] : memref<32x64xbf16, #tpu.memory_space<vmem>>, vector<32x64xbf16>
    %cst_5 = arith.constant dense<0.000000e+00> : vector<2x64xf32>
    %6 = tpu.matmul %4, %5, %cst_5 {dimension_numbers = #tpu.dot_dimension_numbers<[1], [0], [0], [1], [0, 0, 1, 1], [], []>} : vector<2x32xbf16>, vector<32x64xbf16>, vector<2x64xf32> -> vector<2x64xf32>
    %c0_6 = arith.constant 0 : index
    %c0_7 = arith.constant 0 : index
    %7 = vector.load %arg2[%c0_6, %c0_7] : memref<1x64xf32, #tpu.memory_space<vmem>>, vector<1x64xf32>
    %8 = vector.broadcast %7 : vector<1x64xf32> to vector<2x64xf32>
    %9 = arith.addf %6, %8 : vector<2x64xf32>
    %cst_8 = arith.constant 0.000000e+00 : f32
    %10 = vector.broadcast %cst_8 : f32 to vector<2x64xf32>
    %11 = arith.maximumf %9, %10 : vector<2x64xf32>
    %12 = arith.truncf %11 : vector<2x64xf32> to vector<2x64xbf16>
    %c0_9 = arith.constant 0 : index
    %c0_10 = arith.constant 0 : index
    %13 = vector.load %arg3[%c0_9, %c0_10] : memref<64x3xbf16, #tpu.memory_space<vmem>>, vector<64x3xbf16>
    %cst_11 = arith.constant dense<0.000000e+00> : vector<2x3xf32>
    %14 = tpu.matmul %12, %13, %cst_11 {dimension_numbers = #tpu.dot_dimension_numbers<[1], [0], [0], [1], [0, 0, 1, 1], [], []>} : vector<2x64xbf16>, vector<64x3xbf16>, vector<2x3xf32> -> vector<2x3xf32>
    %c0_12 = arith.constant 0 : index
    %c0_13 = arith.constant 0 : index
    %15 = vector.load %arg4[%c0_12, %c0_13] : memref<1x3xf32, #tpu.memory_space<vmem>>, vector<1x3xf32>
    %16 = vector.broadcast %15 : vector<1x3xf32> to vector<2x3xf32>
    %17 = arith.addf %14, %16 : vector<2x3xf32>
    %c0_14 = arith.constant 0 : index
    %c0_15 = arith.constant 0 : index
    %18 = vector.load %arg5[%c0_14, %c0_15] : memref<2x3xf32, #tpu.memory_space<vmem>>, vector<2x3xf32>
    tpu.vector_store %arg5[%c0_14, %c0_15], %17 {strides = array<i32>} : memref<2x3xf32, #tpu.memory_space<vmem>>, vector<2x3xf32>,
    return
  }
}

</mosaic_0001>

<bundles_post_ra>
// kernel: _lambda_.5
= control target key start
LH: loop header
LB: loop body
LE: loop exit
PB: predicated region body
PF: predicated region fallthrough
CT: control target
= control target key end

     0   :  { %v287_v1 = vmov 0.0   ;;  %vm288_vm0 = vmmov 0   ;;  %vm24_vm1 = vcmask 261120   ;;  %s356_s0 = inlined_call_operand.vmem [shape: f32[2,8,32], index: 0, kind: input, shape index: {}]   ;;  %s357_s1 = inlined_call_operand.vmem [shape: bf16[32,64], index: 1, kind: input, shape index: {}]   ;;  %s358_s2 = inlined_call_operand.vmem [shape: f32[1,64], index: 2, kind: input, shape index: {}]   ;;  %s359_s3 = inlined_call_operand.vmem [shape: bf16[64,3], index: 3, kind: input, shape index: {}]   ;;  %s360_s4 = inlined_call_operand.vmem [shape: f32[1,3], index: 4, kind: input, shape index: {}]   ;;  %s361_s5 = inlined_call_operand.hbm [shape: f32[2,3], index: 5, kind: output, shape index: {}]  }
   0x1   :  { %v259_v0 = vld [vmem:[%s357_s1 + $0x8] sm:$0xff]   ;;  %236 = vmatprep.subr.bf16.mxu0 %v287_v1  ;;  %v260_v2 = vld [vmem:[%s357_s1] sm:$0xff]   ;;  %244 = vmatprep.subr.bf16.mxu1 %v287_v1  ;;  %v261_v7 = vld [vmem:[%s359_s3 + $0x18] sm:$0xff]  }
   0x2   :  { %237 = vmatpush3.bf16.msra.mxu0 %v259_v0  ;;  %240 = vmatprep.mubr.msk.bf16.mxu0 %vm288_vm0, %v287_v1  ;;  %v22_v3 = vld [vmem:[%s356_s0] sm:$0xff]  ;;  %v23_v4 = vld [vmem:[%s356_s0 + $0x8] sm:$0xff]  ;;  %v262_v10 = vld [vmem:[%s359_s3 + $0x10] sm:$0xff]  }
   0x3   :  { %238 = vmatprep.subr.bf16.mxu0 %v287_v1  ;;  %v25_v5 = vsel %vm24_vm1, %v22_v3, 0.0  ;;  %v32_v6 = vsel %vm24_vm1, %v23_v4, 0.0  ;;  %252 = vmatprep.mubr.msk.bf16.mxu1 %vm288_vm0, %v287_v1 }
   0x4   :  { %v26_v8 = vrot.slane %v25_v5, 4  ;;  %v33_v9 = vrot.slane %v32_v6, 4  ;;  %245 = vmatpush3.bf16.msra.mxu1 %v261_v7 }
   0x5   :  { %246 = vmatprep.subr.bf16.mxu1 %v287_v1 }
   0x6   :  { %239 = vmatpush3.bf16.msra.mxu0 %v260_v2  ;;  %v27_v11 = vadd.f32 %v26_v8, %v25_v5  ;;  %v34_v12 = vadd.f32 %v33_v9, %v32_v6 }
   0x7   :  { %10 = vsyncpa [#allocation3], 0  ;;  %vm59_vm2 = vcmask 1041409   ;;  %v263_v29 = vld [vmem:[%s359_s3 + $0x8] sm:$0xff]   ;;  %v264_v30 = vld [vmem:[%s359_s3] sm:$0xff]   ;;  %vm158_vm3 = vcmask 523264  }
   0x8   :  { %v28_v13 = vrot.slane %v27_v11, 2  ;;  %v35_v14 = vrot.slane %v34_v12, 2  ;;  %247 = vmatpush3.bf16.msra.mxu1 %v262_v10  ;;  %v218_v31 = vld [vmem:[%s358_s2] ss:$0 sm:$0xff]  ;;  %s289_s11 = smov [#allocation2]   ;;  %vm202_vm4 = vcmask 17408  }
   0x9   :  { %248 = vmatprep.subr.bf16.mxu1 %v287_v1  ;;  %v222_v39 = vld [vmem:[%s360_s4] ss:$0 sm:$0xff]  ;;  %s210_s3 = sshll.u32 %s289_s11, 4  ;;  %s211_s3 = int_to_ptr.vmem [resolvable:$true] %s210_s3 }
   0xa   :  { %v29_v15 = vadd.f32 %v28_v13, %v27_v11  ;;  %v36_v16 = vadd.f32 %v35_v14, %v34_v12  ;;  %s265_s2 = scalar_lea.vmem %s211_s3, 32  ;;  %p270_p1 = scmp.lt.s32.totalorder %s211_s3, %s211_s3 }
   0xb   :  { %p266_p0 = scmp.ne.s32.totalorder %s211_s3, %s265_s2  ;;  %p271_p2 = scmp.lt.s32.totalorder %s265_s2, %s265_s2 }
   0xc   :  { %v30_v17 = vrot.slane %v29_v15, 1  ;;  %v37_v18 = vrot.slane %v36_v16, 1  ;;  %249 = vmatpush3.bf16.msra.mxu1 %v263_v29 }
   0xd   :  { %250 = vmatprep.subr.bf16.mxu1 %v287_v1  ;;  %p272_p3 = por %p271_p2, %p270_p1 }
   0xe   :  { %v31_v19 = vadd.f32 %v30_v17, %v29_v15  ;;  %v38_v20 = vadd.f32 %v37_v18, %v36_v16 }
   0xf   :  { %p273_p4 = pnand %p272_p3, %p266_p0 }
  0x10   :  { %v40_v21 = vmul.f32 0.125, %v31_v19  ;;  %v41_v22 = vmul.f32 0.125, %v38_v20  ;;  %251 = vmatpush3.bf16.msra.mxu1 %v264_v30 }
  0x12   :  { %v42_v23 = vpack.c.bf16 %v40_v21, %v40_v21  ;;  %v43_v24 = vpack.c.bf16 %v41_v22, %v41_v22 }
  0x14   :  { %v57_v25 = vunpack.c.l.b16 %v42_v23  ;;  %v58_v26 = vunpack.c.l.b16 %v43_v24 }
  0x16   :  { %v60_v27 = vsel %vm59_vm2, %v58_v26, %v57_v25 }
  0x17   :  { %v61_v28 = vpack.c.b16 %v60_v27, %v60_v27 }
  0x19   :  { %241 = vmatmul.mubr.msk.bf16.vlgmr.msra.gmra.mxu0 %vm24_vm1, %v61_v28 }
  0xd9   :  { %v111_v32 = vpop.f32.mrf.mxu0 }
  0xda   :  { %v112_v33 = vadd.f32 %v218_v31, %v111_v32 }
  0xdb   :  { %v242_v34 = vpop.f32.mrf.mxu0 }
  0xdc   :  { %v117_v35 = vmax.f32 %v112_v33, 0.0 }
  0xdd   :  { %v114_v36 = vpop.f32.mrf.mxu0 }
  0xde   :  { %v118_v37 = vpack.c.bf16 %v117_v35, %v117_v35 }
  0xdf   :  { %v243_v38 = vpop.f32.mrf.mxu0 }
  0xe0   :  { %253 = vmatmul.mubr.msk.bf16.vlgmr.msra.gmra.mxu1 %vm158_vm3, %v118_v37 }
 0x1a0   :  { %v196_v40 = vpop.f32.mrf.mxu1 }
 0x1a1   :  { %v197_v41 = vadd.f32 %v222_v39, %v196_v40 }
 0x1a2   :  { %v254_v42 = vpop.f32.mrf.mxu1 }
 0x1a3   :  { %203 = vst.msk [vmem:[#allocation2] sm:$0x3] %vm202_vm4, %v197_v41 }
 0x1a4   :  { %v199_v43 = vpop.f32.mrf.mxu1 }
 0x1a5   :  { %276 = shalt.err (!%p273_p4)
}
 0x1a6   :  { %213 = dma.vmem_to_hbm [thread:$0]  %s211_s3, 32, %s361_s5, [#allocation3]   ;;  %v255_v44 = vpop.f32.mrf.mxu1 }
 0x1a7   :  { %285 = dma.done.wait [#allocation3], 32  }
 0x1a8   :  { %286 = vsyncadd [#allocation3], 4294967264 }
 0x1a9   :  { %217 = vsyncpa [#allocation3], 1 }

// kernel: _lambda_.3
= control target key start
LH: loop header
LB: loop body
LE: loop exit
PB: predicated region body
PF: predicated region fallthrough
CT: control target
= control target key end

     0   :  { %v1783_v1 = vmov 0.0   ;;  %vm1784_vm0 = vmmov 0   ;;  %vm77_vm1 = vcmask 261120   ;;  %s2185_s0 = inlined_call_operand.vmem [shape: f32[2,8,32], index: 0, kind: input, shape index: {}]   ;;  %s2186_s1 = inlined_call_operand.vmem [shape: f32[2,1,8], index: 1, kind: input, shape index: {}]   ;;  %s2187_s2 = inlined_call_operand.vmem [shape: bf16[32,96], index: 2, kind: input, shape index: {}]   ;;  %s2188_s3 = inlined_call_operand.vmem [shape: f32[1,96], index: 3, kind: input, shape index: {}]   ;;  %s2189_s4 = inlined_call_operand.vmem [shape: bf16[32,32], index: 4, kind: input, shape index: {}]   ;;  %s2190_s5 = inlined_call_operand.vmem [shape: f32[1,32], index: 5, kind: input, shape index: {}]   ;;  %s2191_s6 = inlined_call_operand.vmem [shape: f32[1,32], index: 6, kind: input, shape index: {}]   ;;  %s2192_s7 = inlined_call_operand.vmem [shape: f32[1,32], index: 7, kind: input, shape index: {}]   ;;  %s2193_s8 = inlined_call_operand.vmem [shape: bf16[32,128], index: 8, kind: input, shape index: {}]   ;;  %s2194_s9 = inlined_call_operand.vmem [shape: f32[1,128], index: 9, kind: input, shape index: {}]   ;;  %s2195_s10 = inlined_call_operand.vmem [shape: bf16[128,32], index: 10, kind: input, shape index: {}]   ;;  %s2196_s11 = inlined_call_operand.vmem [shape: f32[1,32], index: 11, kind: input, shape index: {}]   ;;  %s2197_s12 = inlined_call_operand.vmem [shape: f32[1,32], index: 12, kind: input, shape index: {}]   ;;  %s2198_s13 = inlined_call_operand.vmem [shape: f32[1,32], index: 13, kind: input, shape index: {}]   ;;  %s2199_s14 = inlined_call_operand.vmem [shape: f32[2,8,32], index: 14, kind: output, shape index: {0}]   ;;  %s2200_s15 = inlined_call_operand.hbm [shape: f32[2,4,8,8], index: 15, kind: output, shape index: {1}]  }
   0x1   :  { %v1707_v0 = vld [vmem:[%s2187_s2 + $0x8] sm:$0xff]   ;;  %1533 = vmatprep.subr.bf16.mxu0 %v1783_v1  ;;  %1553 = vmatprep.subr.bf16.mxu1 %v1783_v1  ;;  %v1708_v2 = vld [vmem:[%s2187_s2] sm:$0xff]  }
   0x2   :  { %1534 = vmatpush3.bf16.msra.mxu0 %v1707_v0  ;;  %1537 = vmatprep.mubr.msk.bf16.mxu0 %vm1784_vm0, %v1783_v1  ;;  %v1895_v3 = vld [vmem:[%s2185_s0] sm:$0xff]  ;;  %v1900_v4 = vld [vmem:[%s2185_s0 + $0x8] sm:$0xff] }
   0x3   :  { %1535 = vmatprep.subr.bf16.mxu0 %v1783_v1  ;;  %1555 = vmatprep.mubr.msk.bf16.mxu1 %vm1784_vm0, %v1783_v1  ;;  %v54_v5 = vpack.c.bf16 %v1900_v4, %v1895_v3 }
   0x6   :  { %1536 = vmatpush3.bf16.msra.mxu0 %v1708_v2 }
   0x7   :  { %1541 = vmatprep.subr.bf16.mxu0 %v1783_v1 }
   0x9   :  { %1538 = vmatmul.mubr.msk.bf16.vlgmr.msra.gmra.mxu0 %vm77_vm1, %v54_v5 }
   0xa   :  { %1543 = vmatprep.mubr.msk.bf16.mxu0 %vm1784_vm0, %v1783_v1 }
   0xb   :  { %21 = vsyncpa [#allocation3], 0  ;;  %v1442_v6 = vld [vmem:[%s2188_s3] ss:$0 sm:$0xff]  ;;  %s1785_s26 = smov 96   ;;  %vm131_vm2 = vcmask 64512   ;;  %v231_v19 = vlaneseq }
   0xc   :  { %v124_v20 = vld [vmem:[%s2186_s1] sm:$0x1]  ;;  %v1786_v23 = vmov 0   ;;  %v125_v25 = vld [vmem:[%s2186_s1 + $0x1] sm:$0x1]  ;;  %s1787_s1 = smov 64  }
   0xd   :  { %v232_v21 = vshrl.u32 %v231_v19, 7  ;;  %vm126_vm3 = vcmp.ne.f32.partialorder %v124_v20, 0.0  ;;  %vm127_vm4 = vcmp.ne.f32.partialorder %v125_v25, 0.0  ;;  %s1788_s30 = smov 88   ;;  %vm272_vm7 = vcmask 1043456   ;;  %s1789_s16 = smov 120  }
   0xe   :  { %v229_v24 = vsel %vm126_vm3, 1, %v1786_v23  ;;  %v230_v29 = vsel %vm127_vm4, 1, %v1786_v23  ;;  %s1790_s17 = smov 56   ;;  %s1791_s18 = smov 80   ;;  %vm1070_vm8 = vcmask 130048   ;;  %vm1073_vm9 = vcmask 195584  }
   0xf   :  { %v233_v22 = vsub.s32 0, %v232_v21  ;;  %s1792_s19 = smov 112   ;;  %s1793_s20 = smov 48  }
  0x10   :  { %s1794_s21 = smov 72   ;;  %s1795_s22 = smov 104  }
  0x11   :  { %v1938_v26 = vrot.slane %v229_v24, %v233_v22  ;;  %v1944_v34 = vrot.slane %v230_v29, %v233_v22  ;;  %s1796_s23 = smov 40   ;;  %s1797_s24 = smov 8  }
  0x12   :  { %s1798_s25 = smov 16   ;;  %s1799_s27 = smov 24  }
  0x13   :  { %vm239_vm5 = vcmp.eq.s32.totalorder %v1938_v26, 1  ;;  %vm240_vm6 = vcmp.eq.s32.totalorder %v1944_v34, 1 }
  0xc9   :  { %v115_v7 = vpop.f32.mrf.mxu0 }
  0xca   :  { %v116_v8 = vadd.f32 %v1442_v6, %v115_v7 }
  0xcb   :  { %v1539_v9 = vpop.f32.mrf.mxu0 }
  0xcc   :  { %v1914_v10 = vpack.c.bf16 %v116_v8, %v116_v8 }
  0xcd   :  { %v118_v11 = vpop.f32.mrf.mxu0 }
  0xce   :  { %v119_v12 = vadd.f32 %v1442_v6, %v118_v11  ;;  %129 = vrot.lane.b32.xlu0 %v1914_v10, %s1785_s26 }
  0xcf   :  { %v1540_v13 = vpop.f32.mrf.mxu0 }
  0xd0   :  { %v1917_v14 = vpack.c.bf16 %v119_v12, %v119_v12 }
  0xd2   :  { %179 = vrot.lane.b32.xlu0 %v1917_v14, %s1785_s26 }
 0x140   :  { %v130_v15 = vpop.permute.xlu0 %129 }
 0x141   :  { %v136_v16 = vsel %vm131_vm2, %v130_v15, 0 }
 0x142   :  { %1542 = vmatpush3.bf16.xpose.msra.mxu0 %v136_v16 }
 0x143   :  { %1547 = vmatprep.subr.bf16.mxu0 %v1783_v1 }
 0x144   :  { %v180_v17 = vpop.permute.xlu0 %179 }
 0x145   :  { %v185_v18 = vsel %vm131_vm2, %v180_v17, 0 }
 0x149   :  { %1544 = vmatmul.mubr.msk.bf16.vlgmr.msra.gmra.mxu0 %vm131_vm2, %v1914_v10 }
 0x14a   :  { %1548 = vmatpush3.bf16.xpose.msra.mxu0 %v185_v18  ;;  %1549 = vmatprep.mubr.msk.bf16.mxu0 %vm1784_vm0, %v1783_v1 }
 0x14b   :  { %1559 = vmatprep.subr.bf16.mxu0 %v1783_v1 }
 0x151   :  { %1550 = vmatmul.mubr.msk.bf16.vlgmr.msra.gmra.mxu0 %vm131_vm2, %v1917_v14 }
 0x152   :  { %1561 = vmatprep.mubr.msk.bf16.mxu0 %vm1784_vm0, %v1783_v1 }
 0x209   :  { %v172_v27 = vpop.f32.mrf.mxu0 }
 0x20a   :  { %v227_v28 = vmul.f32 0.35355338, %v172_v27 }
 0x20b   :  { %v1545_v30 = vpop.f32.mrf.mxu0 }
 0x20c   :  { %v241_v31 = vsel %vm239_vm5, %v227_v28, -1e+09 }
 0x20d   :  { %v175_v32 = vpop.f32.mrf.mxu0  ;;  %v243_v33 = vsel %vm131_vm2, %v241_v31, -inf }
 0x20e   :  { %244 = vmax.xlane.f32.xlu1 %v243_v33 }
 0x20f   :  { %v1546_v35 = vpop.f32.mrf.mxu0 }
 0x211   :  { %v221_v36 = vpop.f32.mrf.mxu0 }
 0x212   :  { %v228_v37 = vmul.f32 0.35355338, %v221_v36 }
 0x213   :  { %v1551_v38 = vpop.f32.mrf.mxu0 }
 0x214   :  { %v242_v39 = vsel %vm240_vm6, %v228_v37, -1e+09 }
 0x215   :  { %v224_v40 = vpop.f32.mrf.mxu0  ;;  %v246_v41 = vsel %vm131_vm2, %v242_v39, -inf }
 0x216   :  { %247 = vmax.xlane.f32.xlu1 %v246_v41 }
 0x217   :  { %v1552_v42 = vpop.f32.mrf.mxu0 }
 0x227   :  { %267 = vrot.lane.b32.xlu1 %v1914_v10, %s1787_s1 }
 0x22b   :  { %316 = vrot.lane.b32.xlu1 %v1917_v14, %s1787_s1 }
 0x22f   :  { %366 = vrot.lane.b32.xlu1 %v1914_v10, %s1788_s30 }
 0x297   :  { %v245_v43 = vpop.xlane.xlu1 %244 }
 0x298   :  { %v249_v44 = vsub.f32 %v241_v31, %v245_v43 }
 0x29a   :  { %v251_v45 = vmul.f32 1.442695, %v249_v44 }
 0x29c   :  { %1721 = vpow2.f32 %v251_v45 }
 0x29f   :  { %v248_v46 = vpop.xlane.xlu1 %247 }
 0x2a0   :  { %v250_v47 = vsub.f32 %v242_v39, %v248_v46 }
 0x2a2   :  { %v253_v48 = vmul.f32 1.442695, %v250_v47 }
 0x2a3   :  { %v268_v49 = vpop.permute.xlu1 %267 }
 0x2a4   :  { %1723 = vpow2.f32 %v253_v48  ;;  %v274_v50 = vsel %vm272_vm7, %v268_v49, 0 }
 0x2a5   :  { %1554 = vmatpush3.bf16.msra.mxu1 %v274_v50 }
 0x2a6   :  { %1565 = vmatprep.subr.bf16.mxu1 %v1783_v1 }
 0x2a7   :  { %v317_v51 = vpop.permute.xlu1 %316 }
 0x2a8   :  { %v322_v52 = vsel %vm272_vm7, %v317_v51, 0 }
 0x2a9   :  { %v1722_v53 = vpop.eup %1721  ;;  %1560 = vmatpush3.bf16.msra.mxu0 %v322_v52 }
 0x2aa   :  { %v255_v54 = vsel %vm131_vm2, %v1722_v53, 0.0  ;;  %1571 = vmatprep.subr.bf16.mxu0 %v1783_v1 }
 0x2ab   :  { %256 = vadd.xlane.f32.xlu0 %v255_v54  ;;  %v367_v58 = vpop.permute.xlu1 %366 }
 0x2ac   :  { %v372_v63 = vsel %vm131_vm2, %v367_v58, 0 }
 0x2b1   :  { %v1724_v55 = vpop.eup %1723 }
 0x2b2   :  { %v258_v56 = vsel %vm131_vm2, %v1724_v55, 0.0 }
 0x2b3   :  { %259 = vadd.xlane.f32.xlu1 %v258_v56 }
 0x2c1   :  { %364 = vrot.lane.b32.xlu0 %v1914_v10, %s1789_s16 }
 0x2c4   :  { %416 = vrot.lane.b32.xlu1 %v1917_v14, %s1788_s30 }
 0x2c8   :  { %414 = vrot.lane.b32.xlu1 %v1917_v14, %s1789_s16 }
 0x334   :  { %v257_v57 = vpop.xlane.xlu0 %256 }
 0x335   :  { %1725 = vrcp.f32 %v257_v57 }
 0x338   :  { %v365_v7 = vpop.permute.xlu0 %364 }
 0x33c   :  { %v260_v59 = vpop.xlane.xlu1 %259 }
 0x33d   :  { %1727 = vrcp.f32 %v260_v59 }
 0x340   :  { %v417_v5 = vpop.permute.xlu1 %416 }
 0x341   :  { %v422_v8 = vsel %vm131_vm2, %v417_v5, 0 }
 0x342   :  { %v1726_v60 = vpop.eup %1725 }
 0x343   :  { %v263_v61 = vmul.f32 %v1726_v60, %v1722_v53 }
 0x344   :  { %v415_v9 = vpop.permute.xlu1 %414 }
 0x345   :  { %v265_v62 = vpack.c.bf16 %v263_v61, %v263_v61  ;;  %1036 = vst.msk [vmem:[#allocation2] sm:$0xff] %vm131_vm2, %v263_v61 }
 0x347   :  { %1556 = vmatmul.mubr.msk.bf16.vlgmr.msra.gmra.mxu1 %vm131_vm2, %v265_v62 }
 0x348   :  { %1566 = vmatpush3.bf16.xpose.msra.mxu1 %v372_v63  ;;  %1567 = vmatprep.mubr.msk.bf16.mxu1 %vm1784_vm0, %v1783_v1 }
 0x349   :  { %1577 = vmatprep.subr.bf16.mxu1 %v1783_v1 }
 0x34a   :  { %v1728_v0 = vpop.eup %1727 }
 0x34b   :  { %v264_v2 = vmul.f32 %v1728_v0, %v1724_v55 }
 0x34d   :  { %v266_v6 = vpack.c.bf16 %v264_v2, %v264_v2  ;;  %1040 = vst.msk [vmem:[#allocation2 + $0x20] sm:$0xff] %vm131_vm2, %v264_v2 }
 0x34f   :  { %1562 = vmatmul.mubr.msk.bf16.vlgmr.msra.gmra.mxu0 %vm131_vm2, %v266_v6  ;;  %1568 = vmatmul.mubr.msk.bf16.vlgmr.msra.gmra.mxu1 %vm131_vm2, %v365_v7 }
 0x350   :  { %1572 = vmatpush3.bf16.xpose.msra.mxu0 %v422_v8  ;;  %1573 = vmatprep.mubr.msk.bf16.mxu0 %vm1784_vm0, %v1783_v1 }
 0x351   :  { %1583 = vmatprep.subr.bf16.mxu0 %v1783_v1  ;;  %1579 = vmatprep.mubr.msk.bf16.mxu1 %vm1784_vm0, %v1783_v1 }
 0x357   :  { %1574 = vmatmul.mubr.msk.bf16.vlgmr.msra.gmra.mxu0 %vm131_vm2, %v415_v9 }
 0x358   :  { %1585 = vmatprep.mubr.msk.bf16.mxu0 %vm1784_vm0, %v1783_v1 }
 0x407   :  { %v1980_v11 = vpop.f32.mrf.mxu1 }
 0x409   :  { %v1557_v12 = vpop.f32.mrf.mxu1 }
 0x40b   :  { %v313_v13 = vpop.f32.mrf.mxu1 }
 0x40d   :  { %v1558_v15 = vpop.f32.mrf.mxu1 }
 0x40f   :  { %v1982_v16 = vpop.f32.mrf.mxu0  ;;  %v408_v17 = vpop.f32.mrf.mxu1 }
 0x410   :  { %v464_v18 = vmul.f32 0.35355338, %v408_v17 }
 0x411   :  { %v1563_v19 = vpop.f32.mrf.mxu0  ;;  %v1569_v20 = vpop.f32.mrf.mxu1 }
 0x412   :  { %v466_v21 = vsel %vm239_vm5, %v464_v18, -1e+09 }
 0x413   :  { %v361_v22 = vpop.f32.mrf.mxu0  ;;  %v411_v23 = vpop.f32.mrf.mxu1  ;;  %v468_v24 = vsel %vm131_vm2, %v466_v21, -inf }
 0x414   :  { %469 = vmax.xlane.f32.xlu1 %v468_v24 }
 0x415   :  { %v1564_v25 = vpop.f32.mrf.mxu0  ;;  %v1570_v27 = vpop.f32.mrf.mxu1 }
 0x417   :  { %v458_v28 = vpop.f32.mrf.mxu0 }
 0x418   :  { %v465_v29 = vmul.f32 0.35355338, %v458_v28 }
 0x419   :  { %v1575_v30 = vpop.f32.mrf.mxu0 }
 0x41a   :  { %v467_v31 = vsel %vm240_vm6, %v465_v29, -1e+09 }
 0x41b   :  { %v461_v32 = vpop.f32.mrf.mxu0  ;;  %v471_v33 = vsel %vm131_vm2, %v467_v31, -inf }
 0x41c   :  { %472 = vmax.xlane.f32.xlu0 %v471_v33 }
 0x41d   :  { %v1576_v35 = vpop.f32.mrf.mxu0 }
 0x425   :  { %492 = vrot.lane.b32.xlu1 %v1914_v10, %s1790_s17 }
 0x429   :  { %590 = vrot.lane.b32.xlu1 %v1914_v10, %s1791_s18 }
 0x432   :  { %540 = vrot.lane.b32.xlu0 %v1917_v14, %s1790_s17 }
 0x436   :  { %588 = vrot.lane.b32.xlu0 %v1914_v10, %s1792_s19 }
 0x49d   :  { %v470_v36 = vpop.xlane.xlu1 %469 }
 0x49e   :  { %v474_v37 = vsub.f32 %v466_v21, %v470_v36 }
 0x4a0   :  { %v476_v38 = vmul.f32 1.442695, %v474_v37 }
 0x4a1   :  { %v493_v39 = vpop.permute.xlu1 %492 }
 0x4a2   :  { %1729 = vpow2.f32 %v476_v38  ;;  %v498_v40 = vsel %vm272_vm7, %v493_v39, 0 }
 0x4a3   :  { %1578 = vmatpush3.bf16.msra.mxu1 %v498_v40 }
 0x4a4   :  { %1589 = vmatprep.subr.bf16.mxu1 %v1783_v1 }
 0x4a5   :  { %v473_v41 = vpop.xlane.xlu0 %472  ;;  %v591_v50 = vpop.permute.xlu1 %590 }
 0x4a6   :  { %v475_v42 = vsub.f32 %v467_v31, %v473_v41  ;;  %v596_v56 = vsel %vm131_vm2, %v591_v50, 0 }
 0x4a8   :  { %v478_v43 = vmul.f32 1.442695, %v475_v42 }
 0x4a9   :  { %v541_v44 = vpop.permute.xlu0 %540 }
 0x4aa   :  { %1731 = vpow2.f32 %v478_v43  ;;  %v546_v45 = vsel %vm272_vm7, %v541_v44, 0 }
 0x4ab   :  { %1584 = vmatpush3.bf16.msra.mxu0 %v546_v45 }
 0x4ac   :  { %1595 = vmatprep.subr.bf16.mxu0 %v1783_v1 }
 0x4ad   :  { %v589_v61 = vpop.permute.xlu0 %588 }
 0x4af   :  { %v1730_v46 = vpop.eup %1729 }
 0x4b0   :  { %v480_v47 = vsel %vm131_vm2, %v1730_v46, 0.0 }
 0x4b1   :  { %481 = vadd.xlane.f32.xlu1 %v480_v47 }
 0x4b7   :  { %v1732_v48 = vpop.eup %1731 }
 0x4b8   :  { %v483_v49 = vsel %vm131_vm2, %v1732_v48, 0.0 }
 0x4b9   :  { %484 = vadd.xlane.f32.xlu1 %v483_v49 }
 0x4ca   :  { %640 = vrot.lane.b32.xlu1 %v1917_v14, %s1791_s18 }
 0x4ce   :  { %638 = vrot.lane.b32.xlu1 %v1917_v14, %s1792_s19 }
 0x53a   :  { %v482_v51 = vpop.xlane.xlu1 %481 }
 0x53b   :  { %1733 = vrcp.f32 %v482_v51 }
 0x542   :  { %v485_v52 = vpop.xlane.xlu1 %484 }
 0x543   :  { %1735 = vrcp.f32 %v485_v52 }
 0x546   :  { %v641_v59 = vpop.permute.xlu1 %640 }
 0x547   :  { %v646_v62 = vsel %vm131_vm2, %v641_v59, 0 }
 0x548   :  { %v1734_v53 = vpop.eup %1733 }
 0x549   :  { %v488_v54 = vmul.f32 %v1734_v53, %v1730_v46 }
 0x54a   :  { %v639_v63 = vpop.permute.xlu1 %638 }
 0x54b   :  { %v490_v55 = vpack.c.bf16 %v488_v54, %v488_v54  ;;  %1037 = vst.msk [vmem:[#allocation2 + $0x8] sm:$0xff] %vm131_vm2, %v488_v54 }
 0x54d   :  { %1580 = vmatmul.mubr.msk.bf16.vlgmr.msra.gmra.mxu1 %vm131_vm2, %v490_v55 }
 0x54e   :  { %1590 = vmatpush3.bf16.xpose.msra.mxu1 %v596_v56  ;;  %1591 = vmatprep.mubr.msk.bf16.mxu1 %vm1784_vm0, %v1783_v1 }
 0x54f   :  { %1601 = vmatprep.subr.bf16.mxu1 %v1783_v1 }
 0x550   :  { %v1736_v57 = vpop.eup %1735 }
 0x551   :  { %v489_v58 = vmul.f32 %v1736_v57, %v1732_v48 }
 0x553   :  { %v491_v60 = vpack.c.bf16 %v489_v58, %v489_v58  ;;  %1041 = vst.msk [vmem:[#allocation2 + $0x28] sm:$0xff] %vm131_vm2, %v489_v58 }
 0x555   :  { %1586 = vmatmul.mubr.msk.bf16.vlgmr.msra.gmra.mxu0 %vm131_vm2, %v491_v60  ;;  %1592 = vmatmul.mubr.msk.bf16.vlgmr.msra.gmra.mxu1 %vm131_vm2, %v589_v61 }
 0x556   :  { %1596 = vmatpush3.bf16.xpose.msra.mxu0 %v646_v62  ;;  %1597 = vmatprep.mubr.msk.bf16.mxu0 %vm1784_vm0, %v1783_v1 }
 0x557   :  { %1607 = vmatprep.subr.bf16.mxu0 %v1783_v1  ;;  %1603 = vmatprep.mubr.msk.bf16.mxu1 %vm1784_vm0, %v1783_v1 }
 0x55d   :  { %1598 = vmatmul.mubr.msk.bf16.vlgmr.msra.gmra.mxu0 %vm131_vm2, %v639_v63 }
 0x55e   :  { %1609 = vmatprep.mubr.msk.bf16.mxu0 %vm1784_vm0, %v1783_v1 }
 0x60d   :  { %v2020_v0 = vpop.f32.mrf.mxu1 }
 0x60f   :  { %v1581_v2 = vpop.f32.mrf.mxu1 }
 0x611   :  { %v537_v5 = vpop.f32.mrf.mxu1 }
 0x613   :  { %v1582_v6 = vpop.f32.mrf.mxu1 }
 0x615   :  { %v2022_v7 = vpop.f32.mrf.mxu0  ;;  %v632_v8 = vpop.f32.mrf.mxu1 }
 0x616   :  { %v1692_v9 = vpack.i.bf16 %v2022_v7, %v2020_v0  ;;  %v688_v12 = vmul.f32 0.35355338, %v632_v8 }
 0x617   :  { %v1587_v13 = vpop.f32.mrf.mxu0  ;;  %v1593_v15 = vpop.f32.mrf.mxu1 }
 0x618   :  { %v690_v17 = vsel %vm239_vm5, %v688_v12, -1e+09 }
 0x619   :  { %v585_v18 = vpop.f32.mrf.mxu0  ;;  %v635_v19 = vpop.f32.mrf.mxu1  ;;  %v692_v20 = vsel %vm131_vm2, %v690_v17, -inf }
 0x61a   :  { %693 = vmax.xlane.f32.xlu0 %v692_v20 }
 0x61b   :  { %v1588_v21 = vpop.f32.mrf.mxu0  ;;  %v1594_v22 = vpop.f32.mrf.mxu1 }
 0x61d   :  { %v682_v23 = vpop.f32.mrf.mxu0 }
 0x61e   :  { %v689_v24 = vmul.f32 0.35355338, %v682_v23 }
 0x61f   :  { %v1599_v25 = vpop.f32.mrf.mxu0 }
 0x620   :  { %v691_v27 = vsel %vm240_vm6, %v689_v24, -1e+09 }
 0x621   :  { %v685_v28 = vpop.f32.mrf.mxu0  ;;  %v695_v29 = vsel %vm131_vm2, %v691_v27, -inf }
 0x622   :  { %696 = vmax.xlane.f32.xlu1 %v695_v29 }
 0x623   :  { %v1600_v30 = vpop.f32.mrf.mxu0 }
 0x633   :  { %716 = vrot.lane.b32.xlu1 %v1914_v10, %s1793_s20 }
 0x637   :  { %814 = vrot.lane.b32.xlu1 %v1914_v10, %s1794_s21 }
 0x63b   :  { %864 = vrot.lane.b32.xlu1 %v1917_v14, %s1794_s21 }
 0x63f   :  { %862 = vrot.lane.b32.xlu1 %v1917_v14, %s1795_s22 }
 0x6a3   :  { %v694_v31 = vpop.xlane.xlu0 %693 }
 0x6a4   :  { %v698_v32 = vsub.f32 %v690_v17, %v694_v31 }
 0x6a6   :  { %v700_v33 = vmul.f32 1.442695, %v698_v32 }
 0x6a8   :  { %1737 = vpow2.f32 %v700_v33 }
 0x6ab   :  { %v697_v35 = vpop.xlane.xlu1 %696 }
 0x6ac   :  { %v699_v36 = vsub.f32 %v691_v27, %v697_v35 }
 0x6ae   :  { %v702_v37 = vmul.f32 1.442695, %v699_v36 }
 0x6af   :  { %v717_v38 = vpop.permute.xlu1 %716 }
 0x6b0   :  { %1739 = vpow2.f32 %v702_v37  ;;  %v722_v39 = vsel %vm272_vm7, %v717_v38, 0 }
 0x6b1   :  { %1602 = vmatpush3.bf16.msra.mxu1 %v722_v39 }
 0x6b2   :  { %1613 = vmatprep.subr.bf16.mxu1 %v1783_v1 }
 0x6b3   :  { %v815_v50 = vpop.permute.xlu1 %814 }
 0x6b4   :  { %v820_v52 = vsel %vm131_vm2, %v815_v50, 0 }
 0x6b5   :  { %v1738_v40 = vpop.eup %1737 }
 0x6b6   :  { %v704_v41 = vsel %vm131_vm2, %v1738_v40, 0.0 }
 0x6b7   :  { %705 = vadd.xlane.f32.xlu0 %v704_v41  ;;  %v865_v55 = vpop.permute.xlu1 %864 }
 0x6b8   :  { %v870_v58 = vsel %vm131_vm2, %v865_v55, 0 }
 0x6bb   :  { %v863_v59 = vpop.permute.xlu1 %862 }
 0x6bd   :  { %v1740_v42 = vpop.eup %1739 }
 0x6be   :  { %v707_v43 = vsel %vm131_vm2, %v1740_v42, 0.0 }
 0x6bf   :  { %708 = vadd.xlane.f32.xlu0 %v707_v43 }
 0x6d5   :  { %764 = vrot.lane.b32.xlu0 %v1917_v14, %s1793_s20 }
 0x6d9   :  { %812 = vrot.lane.b32.xlu0 %v1914_v10, %s1795_s22 }
 0x740   :  { %v706_v44 = vpop.xlane.xlu0 %705 }
 0x741   :  { %1741 = vrcp.f32 %v706_v44 }
 0x748   :  { %v709_v45 = vpop.xlane.xlu0 %708 }
 0x749   :  { %1743 = vrcp.f32 %v709_v45 }
 0x74c   :  { %v765_v46 = vpop.permute.xlu0 %764 }
 0x74d   :  { %v770_v47 = vsel %vm272_vm7, %v765_v46, 0  ;;  %v1709_v46 = vld [vmem:[%s2189_s4 + $0x8] sm:$0xff]  }
 0x74e   :  { %v1742_v48 = vpop.eup %1741  ;;  %1608 = vmatpush3.bf16.msra.mxu0 %v770_v47  ;;  %v1710_v47 = vld [vmem:[%s2189_s4] sm:$0xff]  }
 0x74f   :  { %v712_v49 = vmul.f32 %v1742_v48, %v1738_v40  ;;  %1619 = vmatprep.subr.bf16.mxu0 %v1783_v1 }
 0x750   :  { %v813_v57 = vpop.permute.xlu0 %812 }
 0x751   :  { %v714_v51 = vpack.c.bf16 %v712_v49, %v712_v49  ;;  %1038 = vst.msk [vmem:[#allocation2 + $0x10] sm:$0xff] %vm131_vm2, %v712_v49 }
 0x753   :  { %1604 = vmatmul.mubr.msk.bf16.vlgmr.msra.gmra.mxu1 %vm131_vm2, %v714_v51 }
 0x754   :  { %1614 = vmatpush3.bf16.xpose.msra.mxu1 %v820_v52  ;;  %1615 = vmatprep.mubr.msk.bf16.mxu1 %vm1784_vm0, %v1783_v1 }
 0x755   :  { %1625 = vmatprep.subr.bf16.mxu1 %v1783_v1 }
 0x756   :  { %v1744_v53 = vpop.eup %1743 }
 0x757   :  { %v713_v54 = vmul.f32 %v1744_v53, %v1740_v42 }
 0x759   :  { %v715_v56 = vpack.c.bf16 %v713_v54, %v713_v54  ;;  %1042 = vst.msk [vmem:[#allocation2 + $0x30] sm:$0xff] %vm131_vm2, %v713_v54 }
 0x75b   :  { %1610 = vmatmul.mubr.msk.bf16.vlgmr.msra.gmra.mxu0 %vm131_vm2, %v715_v56  ;;  %1616 = vmatmul.mubr.msk.bf16.vlgmr.msra.gmra.mxu1 %vm131_vm2, %v813_v57 }
 0x75c   :  { %1620 = vmatpush3.bf16.xpose.msra.mxu0 %v870_v58  ;;  %1621 = vmatprep.mubr.msk.bf16.mxu0 %vm1784_vm0, %v1783_v1 }
 0x75d   :  { %1631 = vmatprep.subr.bf16.mxu0 %v1783_v1  ;;  %1627 = vmatprep.mubr.msk.bf16.mxu1 %vm1784_vm0, %v1783_v1 }
 0x763   :  { %1622 = vmatmul.mubr.msk.bf16.vlgmr.msra.gmra.mxu0 %vm131_vm2, %v863_v59 }
 0x764   :  { %1633 = vmatprep.mubr.msk.bf16.mxu0 %vm1784_vm0, %v1783_v1 }
 0x813   :  { %v758_v60 = vpop.f32.mrf.mxu1 }
 0x815   :  { %v1605_v61 = vpop.f32.mrf.mxu1 }
 0x817   :  { %v761_v62 = vpop.f32.mrf.mxu1 }
 0x819   :  { %v1606_v63 = vpop.f32.mrf.mxu1 }
 0x81b   :  { %v806_v2 = vpop.f32.mrf.mxu0  ;;  %v856_v5 = vpop.f32.mrf.mxu1 }
 0x81c   :  { %v912_v6 = vmul.f32 0.35355338, %v856_v5  ;;  %v1697_v26 = vpack.i.bf16 %v806_v2, %v758_v60 }
 0x81d   :  { %v1611_v8 = vpop.f32.mrf.mxu0  ;;  %v1617_v12 = vpop.f32.mrf.mxu1 }
 0x81e   :  { %v914_v13 = vsel %vm239_vm5, %v912_v6, -1e+09 }
 0x81f   :  { %v809_v15 = vpop.f32.mrf.mxu0  ;;  %v859_v17 = vpop.f32.mrf.mxu1  ;;  %v916_v18 = vsel %vm131_vm2, %v914_v13, -inf }
 0x820   :  { %917 = vmax.xlane.f32.xlu0 %v916_v18 }
 0x821   :  { %v1612_v19 = vpop.f32.mrf.mxu0  ;;  %v1618_v20 = vpop.f32.mrf.mxu1 }
 0x822   :  { %v1462_v19 = vld [vmem:[%s2190_s5] ss:$0 sm:$0xff] }
 0x823   :  { %v906_v21 = vpop.f32.mrf.mxu0 }
 0x824   :  { %v913_v22 = vmul.f32 0.35355338, %v906_v21 }
 0x825   :  { %v1623_v23 = vpop.f32.mrf.mxu0 }
 0x826   :  { %v915_v24 = vsel %vm240_vm6, %v913_v22, -1e+09 }
 0x827   :  { %v909_v25 = vpop.f32.mrf.mxu0  ;;  %v919_v27 = vsel %vm131_vm2, %v915_v24, -inf }
 0x828   :  { %920 = vmax.xlane.f32.xlu1 %v919_v27 }
 0x829   :  { %v1624_v28 = vpop.f32.mrf.mxu0 }
 0x839   :  { %940 = vrot.lane.b32.xlu1 %v1914_v10, %s1796_s23 }
 0x83d   :  { %1693 = vrot.lane.b32.xlu1 %v1692_v9, %s1797_s24 }
 0x841   :  { %1698 = vrot.lane.b32.xlu1 %v1697_v26, %s1798_s25 }
 0x8a9   :  { %v918_v29 = vpop.xlane.xlu0 %917 }
 0x8aa   :  { %v922_v34 = vsub.f32 %v914_v13, %v918_v29 }
 0x8ac   :  { %v924_v30 = vmul.f32 1.442695, %v922_v34 }
 0x8ae   :  { %1745 = vpow2.f32 %v924_v30 }
 0x8b1   :  { %v921_v31 = vpop.xlane.xlu1 %920 }
 0x8b2   :  { %v923_v32 = vsub.f32 %v915_v24, %v921_v31 }
 0x8b4   :  { %v926_v33 = vmul.f32 1.442695, %v923_v32 }
 0x8b5   :  { %v941_v35 = vpop.permute.xlu1 %940 }
 0x8b6   :  { %1747 = vpow2.f32 %v926_v33  ;;  %v946_v10 = vsel %vm272_vm7, %v941_v35, 0 }
 0x8b7   :  { %1626 = vmatpush3.bf16.msra.mxu1 %v946_v10 }
 0x8b8   :  { %1637 = vmatprep.subr.bf16.mxu1 %v1783_v1 }
 0x8b9   :  { %v1694_v57 = vpop.permute.xlu1 %1693 }
 0x8ba   :  { %v1696_v59 = vunpack.i.h.bf16 %v1694_v57  ;;  %v1695_v60 = vunpack.i.l.bf16 %v1694_v57  ;;  %v1720_v57 = vld [vmem:[%s2195_s10] sm:$0xff]  }
 0x8bb   :  { %v1746_v36 = vpop.eup %1745 }
 0x8bc   :  { %v928_v0 = vsel %vm131_vm2, %v1746_v36, 0.0  ;;  %v1069_v2 = vsel %vm131_vm2, %v1982_v16, %v1696_v59  ;;  %v1068_v5 = vsel %vm131_vm2, %v1980_v11, %v1695_v60 }
 0x8bd   :  { %929 = vadd.xlane.f32.xlu0 %v928_v0  ;;  %v1699_v58 = vpop.permute.xlu1 %1698  ;;  %v1713_v0 = vld [vmem:[%s2195_s10 + $0x38] sm:$0xff]  }
 0x8be   :  { %v1701_v61 = vunpack.i.h.bf16 %v1699_v58  ;;  %v1700_v62 = vunpack.i.l.bf16 %v1699_v58  ;;  %v1468_v58 = vld [vmem:[%s2194_s9] ss:$0 sm:$0xff]  ;;  %s1800_s9 = smov [#allocation2]  }
 0x8c0   :  { %v1071_v12 = vsel %vm1070_vm8, %v1068_v5, %v1700_v62  ;;  %v1072_v13 = vsel %vm1070_vm8, %v1069_v2, %v1701_v61 }
 0x8c3   :  { %v1748_v7 = vpop.eup %1747 }
 0x8c4   :  { %v931_v9 = vsel %vm131_vm2, %v1748_v7, 0.0 }
 0x8c5   :  { %932 = vadd.xlane.f32.xlu0 %v931_v9  ;;  %v1715_v9 = vld [vmem:[%s2195_s10 + $0x28] sm:$0xff]  }
 0x8db   :  { %988 = vrot.lane.b32.xlu0 %v1917_v14, %s1796_s23 }
 0x946   :  { %v930_v37 = vpop.xlane.xlu0 %929 }
 0x947   :  { %1749 = vrcp.f32 %v930_v37  ;;  %v1716_v37 = vld [vmem:[%s2195_s10 + $0x20] sm:$0xff]  }
 0x94e   :  { %v933_v38 = vpop.xlane.xlu0 %932 }
 0x94f   :  { %1751 = vrcp.f32 %v933_v38  ;;  %v1717_v38 = vld [vmem:[%s2195_s10 + $0x18] sm:$0xff]  }
 0x952   :  { %v989_v39 = vpop.permute.xlu0 %988 }
 0x953   :  { %v994_v40 = vsel %vm272_vm7, %v989_v39, 0 }
 0x954   :  { %v1750_v41 = vpop.eup %1749  ;;  %1632 = vmatpush3.bf16.msra.mxu0 %v994_v40 }
 0x955   :  { %v936_v42 = vmul.f32 %v1750_v41, %v1746_v36  ;;  %1645 = vmatprep.subr.bf16.mxu0 %v1783_v1  ;;  %v1712_v36 = vld [vmem:[%s2193_s8] sm:$0xff]  }
 0x957   :  { %v938_v43 = vpack.c.bf16 %v936_v42, %v936_v42  ;;  %1039 = vst.msk [vmem:[#allocation2 + $0x18] sm:$0xff] %vm131_vm2, %v936_v42 }
 0x959   :  { %1628 = vmatmul.mubr.msk.bf16.vlgmr.msra.gmra.mxu1 %vm131_vm2, %v938_v43 }
 0x95a   :  { %1641 = vmatprep.mubr.msk.bf16.mxu1 %vm1784_vm0, %v1783_v1  ;;  %1638 = vmatpush3.bf16.msra.mxu1 %v1709_v46  ;;  %v1466_v46 = vld [vmem:[%s2191_s6] ss:$0 sm:$0xff] }
 0x95b   :  { %1639 = vmatprep.subr.bf16.mxu1 %v1783_v1 }
 0x95c   :  { %v1752_v14 = vpop.eup %1751 }
 0x95d   :  { %v937_v44 = vmul.f32 %v1752_v14, %v1748_v7  ;;  %v1714_v7 = vld [vmem:[%s2195_s10 + $0x30] sm:$0xff]  }
 0x95e   :  { %1640 = vmatpush3.bf16.msra.mxu1 %v1710_v47 }
 0x95f   :  { %v939_v45 = vpack.c.bf16 %v937_v44, %v937_v44  ;;  %1043 = vst.msk [vmem:[#allocation2 + $0x38] sm:$0xff] %vm131_vm2, %v937_v44  ;;  %1653 = vmatprep.subr.bf16.mxu1 %v1783_v1 }
 0x961   :  { %1634 = vmatmul.mubr.msk.bf16.vlgmr.msra.gmra.mxu0 %vm131_vm2, %v939_v45 }
 0x962   :  { %1649 = vmatprep.mubr.msk.bf16.mxu0 %vm1784_vm0, %v1783_v1 }
 0xa19   :  { %v982_v48 = vpop.f32.mrf.mxu1 }
 0xa1b   :  { %v1629_v49 = vpop.f32.mrf.mxu1 }
 0xa1d   :  { %v985_v50 = vpop.f32.mrf.mxu1 }
 0xa1e   :  { %v1467_v50 = vld [vmem:[%s2192_s7] ss:$0 sm:$0xff] }
 0xa1f   :  { %v1630_v51 = vpop.f32.mrf.mxu1 }
 0xa21   :  { %v1030_v52 = vpop.f32.mrf.mxu0 }
 0xa22   :  { %v1702_v53 = vpack.i.bf16 %v1030_v52, %v982_v48 }
 0xa23   :  { %v1635_v54 = vpop.f32.mrf.mxu0 }
 0xa24   :  { %1703 = vrot.lane.b32.xlu0 %v1702_v53, %s1799_s27 }
 0xa25   :  { %v1033_v55 = vpop.f32.mrf.mxu0 }
 0xa26   :  { %v1718_v55 = vld [vmem:[%s2195_s10 + $0x10] sm:$0xff]  }
 0xa27   :  { %v1636_v56 = vpop.f32.mrf.mxu0 }
 0xa28   :  { %v1719_v56 = vld [vmem:[%s2195_s10 + $0x8] sm:$0xff]   ;;  %s1429_s10 = sshll.u32 %s1800_s9, 4  ;;  %s1430_s10 = int_to_ptr.vmem [resolvable:$true] %s1429_s10 }
 0xa29   :  { %p1766_p1 = scmp.lt.s32.totalorder %s1430_s10, %s1430_s10 }
 0xa96   :  { %v1704_v63 = vpop.permute.xlu0 %1703 }
 0xa97   :  { %v1706_v6 = vunpack.i.h.bf16 %v1704_v63  ;;  %v1705_v8 = vunpack.i.l.bf16 %v1704_v63 }
 0xa99   :  { %v1075_v15 = vsel %vm1073_vm9, %v1072_v13, %v1706_v6  ;;  %v1074_v17 = vsel %vm1073_vm9, %v1071_v12, %v1705_v8 }
 0xa9a   :  { %v1077_v18 = vpack.c.bf16 %v1075_v15, %v1074_v17 }
 0xa9c   :  { %1642 = vmatmul.mubr.msk.bf16.vlgmr.msra.gmra.mxu1 %vm77_vm1, %v1077_v18 }
 0xa9d   :  { %1669 = vmatprep.mubr.msk.bf16.mxu1 %vm1784_vm0, %v1783_v1  ;;  %1654 = vmatpush3.bf16.msra.mxu1 %v1713_v0 }
 0xa9e   :  { %1655 = vmatprep.subr.bf16.mxu1 %v1783_v1 }
 0xaa1   :  { %1656 = vmatpush3.bf16.msra.mxu1 %v1714_v7 }
 0xaa2   :  { %1657 = vmatprep.subr.bf16.mxu1 %v1783_v1 }
 0xaa5   :  { %1658 = vmatpush3.bf16.msra.mxu1 %v1715_v9 }
 0xaa6   :  { %1659 = vmatprep.subr.bf16.mxu1 %v1783_v1 }
 0xaa9   :  { %1660 = vmatpush3.bf16.msra.mxu1 %v1716_v37 }
 0xaaa   :  { %1661 = vmatprep.subr.bf16.mxu1 %v1783_v1 }
 0xaad   :  { %1662 = vmatpush3.bf16.msra.mxu1 %v1717_v38 }
 0xaae   :  { %1663 = vmatprep.subr.bf16.mxu1 %v1783_v1 }
 0xab1   :  { %1664 = vmatpush3.bf16.msra.mxu1 %v1718_v55 }
 0xab2   :  { %1665 = vmatprep.subr.bf16.mxu1 %v1783_v1 }
 0xab5   :  { %1666 = vmatpush3.bf16.msra.mxu1 %v1719_v56 }
 0xab6   :  { %1667 = vmatprep.subr.bf16.mxu1 %v1783_v1 }
 0xab9   :  { %1668 = vmatpush3.bf16.msra.mxu1 %v1720_v57 }
 0xb5c   :  { %v1137_v16 = vpop.f32.mrf.mxu1 }
 0xb5d   :  { %v1138_v20 = vadd.f32 %v1462_v19, %v1137_v16 }
 0xb5e   :  { %v1643_v21 = vpop.f32.mrf.mxu1 }
 0xb5f   :  { %v1144_v11 = vadd.f32 %v1138_v20, %v1895_v3 }
 0xb60   :  { %v1140_v22 = vpop.f32.mrf.mxu1 }
 0xb61   :  { %v1141_v23 = vadd.f32 %v1462_v19, %v1140_v22  ;;  %v1146_v24 = vsel %vm77_vm1, %v1144_v11, 0.0 }
 0xb62   :  { %1147 = vadd.xlane.f32.xlu1 %v1146_v24  ;;  %v1644_v25 = vpop.f32.mrf.mxu1 }
 0xb63   :  { %v1145_v27 = vadd.f32 %v1141_v23, %v1900_v4  ;;  %v1711_v4 = vld [vmem:[%s2193_s8 + $0x8] sm:$0xff]  }
 0xb64   :  { %1646 = vmatpush3.bf16.msra.mxu0 %v1711_v4 }
 0xb65   :  { %v1149_v28 = vsel %vm77_vm1, %v1145_v27, 0.0  ;;  %1647 = vmatprep.subr.bf16.mxu0 %v1783_v1  ;;  %v1472_v1 = vld [vmem:[%s2196_s11] ss:$0 sm:$0xff]  ;;  %s1761_s11 = scalar_lea.vmem %s1430_s10, 1024 }
 0xb66   :  { %1150 = vadd.xlane.f32.xlu0 %v1149_v28  ;;  %p1762_p0 = scmp.ne.s32.totalorder %s1430_s10, %s1761_s11  ;;  %p1767_p2 = scmp.lt.s32.totalorder %s1761_s11, %s1761_s11 }
 0xb68   :  { %1648 = vmatpush3.bf16.msra.mxu0 %v1712_v36  ;;  %p1768_p3 = por %p1767_p2, %p1766_p1 }
 0xb6a   :  { %p1769_p4 = pnand %p1768_p3, %p1762_p0 }
 0xbeb   :  { %v1148_v26 = vpop.xlane.xlu1 %1147 }
 0xbec   :  { %v1153_v29 = vmul.f32 0.03125, %v1148_v26 }
 0xbee   :  { %v1155_v34 = vsub.f32 %v1144_v11, %v1153_v29 }
 0xbef   :  { %v1151_v30 = vpop.xlane.xlu0 %1150 }
 0xbf0   :  { %v1154_v31 = vmul.f32 0.03125, %v1151_v30  ;;  %v1157_v32 = vmul.f32 %v1155_v34, %v1155_v34 }
 0xbf2   :  { %v1156_v33 = vsub.f32 %v1145_v27, %v1154_v31  ;;  %v1159_v3 = vsel %vm77_vm1, %v1157_v32, 0.0 }
 0xbf3   :  { %1160 = vadd.xlane.f32.xlu0 %v1159_v3 }
 0xbf4   :  { %v1158_v35 = vmul.f32 %v1156_v33, %v1156_v33 }
 0xbf6   :  { %v1162_v10 = vsel %vm77_vm1, %v1158_v35, 0.0 }
 0xbf7   :  { %1163 = vadd.xlane.f32.xlu1 %v1162_v10 }
 0xc7c   :  { %v1161_v39 = vpop.xlane.xlu0 %1160 }
 0xc7d   :  { %v1165_v40 = vmul.f32 0.03125, %v1161_v39 }
 0xc7f   :  { %v1167_v41 = vadd.f32 1e-05, %v1165_v40 }
 0xc80   :  { %v1164_v42 = vpop.xlane.xlu1 %1163 }
 0xc81   :  { %1753 = vrsqrt.f32 %v1167_v41  ;;  %v1166_v43 = vmul.f32 0.03125, %v1164_v42 }
 0xc83   :  { %v1168_v14 = vadd.f32 1e-05, %v1166_v43 }
 0xc85   :  { %1755 = vrsqrt.f32 %v1168_v14 }
 0xc8e   :  { %v1754_v44 = vpop.eup %1753 }
 0xc8f   :  { %v1171_v45 = vmul.f32 %v1754_v44, %v1155_v34 }
 0xc91   :  { %v1180_v49 = vmul.f32 %v1466_v46, %v1171_v45 }
 0xc92   :  { %v1756_v47 = vpop.eup %1755 }
 0xc93   :  { %v1172_v48 = vmul.f32 %v1756_v47, %v1156_v33  ;;  %v1189_v52 = vadd.f32 %v1467_v50, %v1180_v49 }
 0xc95   :  { %v1181_v51 = vmul.f32 %v1466_v46, %v1172_v48 }
 0xc97   :  { %v1190_v53 = vadd.f32 %v1467_v50, %v1181_v51 }
 0xc99   :  { %v1192_v54 = vpack.c.bf16 %v1190_v53, %v1189_v52 }
 0xc9b   :  { %1650 = vmatmul.mubr.msk.bf16.vlgmr.msra.gmra.mxu0 %vm77_vm1, %v1192_v54 }
 0xd5b   :  { %v1252_v59 = vpop.f32.mrf.mxu0 }
 0xd5c   :  { %v1253_v61 = vadd.f32 %v1468_v58, %v1252_v59 }
 0xd5d   :  { %v1651_v60 = vpop.f32.mrf.mxu0 }
 0xd5e   :  { %v1259_v5 = vmax.f32 %v1253_v61, 0.0 }
 0xd5f   :  { %v1255_v62 = vpop.f32.mrf.mxu0 }
 0xd60   :  { %v1256_v63 = vadd.f32 %v1468_v58, %v1255_v62 }
 0xd61   :  { %v1652_v2 = vpop.f32.mrf.mxu0 }
 0xd62   :  { %v1260_v6 = vmax.f32 %v1256_v63, 0.0 }
 0xd64   :  { %v1262_v8 = vpack.c.bf16 %v1260_v6, %v1259_v5 }
 0xd66   :  { %1670 = vmatmul.mubr.bf16.vlgmr.msra.gmra.mxu1 %v1262_v8 }
 0xe26   :  { %v1367_v12 = vpop.f32.mrf.mxu1 }
 0xe27   :  { %v1368_v13 = vadd.f32 %v1472_v1, %v1367_v12 }
 0xe28   :  { %v1671_v15 = vpop.f32.mrf.mxu1 }
 0xe29   :  { %v1374_v17 = vadd.f32 %v1368_v13, %v1189_v52 }
 0xe2a   :  { %v1370_v18 = vpop.f32.mrf.mxu1 }
 0xe2b   :  { %v1371_v19 = vadd.f32 %v1472_v1, %v1370_v18  ;;  %v1376_v16 = vsel %vm77_vm1, %v1374_v17, 0.0 }
 0xe2c   :  { %1377 = vadd.xlane.f32.xlu0 %v1376_v16  ;;  %v1672_v20 = vpop.f32.mrf.mxu1 }
 0xe2d   :  { %v1375_v21 = vadd.f32 %v1371_v19, %v1190_v53 }
 0xe2f   :  { %v1379_v11 = vsel %vm77_vm1, %v1375_v21, 0.0 }
 0xe30   :  { %1380 = vadd.xlane.f32.xlu1 %v1379_v11 }
 0xeb5   :  { %v1378_v22 = vpop.xlane.xlu0 %1377 }
 0xeb6   :  { %v1382_v23 = vmul.f32 0.03125, %v1378_v22 }
 0xeb8   :  { %v1384_v24 = vsub.f32 %v1374_v17, %v1382_v23 }
 0xeb9   :  { %v1381_v25 = vpop.xlane.xlu1 %1380 }
 0xeba   :  { %v1383_v27 = vmul.f32 0.03125, %v1381_v25  ;;  %v1386_v28 = vmul.f32 %v1384_v24, %v1384_v24 }
 0xebc   :  { %v1385_v26 = vsub.f32 %v1375_v21, %v1383_v27  ;;  %v1388_v29 = vsel %vm77_vm1, %v1386_v28, 0.0 }
 0xebd   :  { %1389 = vadd.xlane.f32.xlu0 %v1388_v29 }
 0xebe   :  { %v1387_v34 = vmul.f32 %v1385_v26, %v1385_v26 }
 0xec0   :  { %v1391_v30 = vsel %vm77_vm1, %v1387_v34, 0.0 }
 0xec1   :  { %1392 = vadd.xlane.f32.xlu1 %v1391_v30 }
 0xec2   :  { %1772 = shalt.err (!%p1769_p4)
}
 0xec3   :  { %s1801_s17 = smov 128   ;;  %v1481_v36 = vld [vmem:[%s2197_s12] ss:$0 sm:$0xff] }
 0xec4   :  { %1435 = dma.vmem_to_hbm [thread:$0]  %s1430_s10, 1024, %s2200_s15, [#allocation3], %s1801_s17, %s1801_s17, %s1797_s24  }
 0xec5   :  { %v1482_v7 = vld [vmem:[%s2198_s13] ss:$0 sm:$0xff] }
 0xf46   :  { %v1390_v31 = vpop.xlane.xlu0 %1389 }
 0xf47   :  { %v1394_v32 = vmul.f32 0.03125, %v1390_v31 }
 0xf49   :  { %v1396_v33 = vadd.f32 1e-05, %v1394_v32 }
 0xf4a   :  { %v1393_v3 = vpop.xlane.xlu1 %1392 }
 0xf4b   :  { %1757 = vrsqrt.f32 %v1396_v33  ;;  %v1395_v35 = vmul.f32 0.03125, %v1393_v3 }
 0xf4d   :  { %v1397_v10 = vadd.f32 1e-05, %v1395_v35 }
 0xf4f   :  { %1759 = vrsqrt.f32 %v1397_v10 }
 0xf58   :  { %v1758_v4 = vpop.eup %1757 }
 0xf59   :  { %v1400_v0 = vmul.f32 %v1758_v4, %v1384_v24 }
 0xf5b   :  { %v1409_v9 = vmul.f32 %v1481_v36, %v1400_v0 }
 0xf5c   :  { %v1760_v37 = vpop.eup %1759 }
 0xf5d   :  { %v1418_v38 = vadd.f32 %v1482_v7, %v1409_v9  ;;  %v1401_v39 = vmul.f32 %v1760_v37, %v1385_v26 }
 0xf5f   :  { %1420 = vst.msk [vmem:[%s2199_s14] sm:$0xff] %vm77_vm1, %v1418_v38  ;;  %v1410_v40 = vmul.f32 %v1481_v36, %v1401_v39 }
 0xf61   :  { %v1419_v41 = vadd.f32 %v1482_v7, %v1410_v40 }
 0xf63   :  { %1421 = vst.msk [vmem:[%s2199_s14 + $0x8] sm:$0xff] %vm77_vm1, %v1419_v41 }
 0xf64   :  { %1781 = dma.done.wait [#allocation3], 1024  }
 0xf65   :  { %1782 = vsyncadd [#allocation3], 4294966272 }
 0xf66   :  { %1441 = vsyncpa [#allocation3], 1 }

</bundles_post_ra>
